<compile_context>
chip_gen: v6e
topology: v6e:2x2x1
jax: 0.10.0
libtpu: 0.0.40
codegen_flags: <defaults>
</compile_context>

<pallas_src>
import functools

import jax
import jax.numpy as jnp
from jax.experimental import pallas as pl
from jax.experimental.pallas import tpu as pltpu


# ----------------------------------------------------------------------------
# helpers
# ----------------------------------------------------------------------------

_NEG_SLOPE = 0.01  # torch.nn.LeakyReLU default


def _leaky_relu(x):
    return jnp.where(x > 0, x, _NEG_SLOPE * x)


def _dot(a, b):
    return jnp.dot(a, b, preferred_element_type=jnp.float32)


# ----------------------------------------------------------------------------
# fused Pallas kernel (whole forward pass)
# ----------------------------------------------------------------------------

def _make_fused_kernel(n_blocks):
    """Build the fused encode-process-decode kernel for a static n_blocks."""

    def kernel(*refs):
        # ---- unpack refs ---------------------------------------------------
        (x_ref, ea_ref, sdst_ref, ssrc_ref, sdstT_ref, invdeg_ref,
         t_ref) = refs[:7]
        idx = 7
        enc_n = refs[idx:idx + 4]; idx += 4          # encoder_nodes
        enc_e = refs[idx:idx + 4]; idx += 4          # encoder_edges
        blocks = []
        for _ in range(n_blocks):                    # 11 refs per GNN block
            blocks.append(refs[idx:idx + 11]); idx += 11
        dec_n = refs[idx:idx + 4]; idx += 4          # decoder_nodes
        dec_g = refs[idx:idx + 6]; idx += 6          # decoder_glob
        y_ref, glob_ref = refs[idx], refs[idx + 1]   # outputs

        def mlp2(v, p):                              # MiniMLP, 1 hidden layer
            w1, b1, w2, b2 = p
            h = _leaky_relu(_dot(v, w1[...]) + b1[...])
            return _dot(h, w2[...]) + b2[...]

        # ---- loop-invariant graph structure (stays in VMEM for whole call) --
        sdst = sdst_ref[...]        # (E, N) one-hot of edge targets
        ssrc = ssrc_ref[...]        # (E, N) one-hot of edge sources
        sdst_t = sdstT_ref[...]     # (N, E) transposed target selector
        inv_deg = invdeg_ref[...]   # (N, 1) 1 / max(in_degree, 1)

        # ---- encode ----------------------------------------------------------
        node = mlp2(x_ref[...], enc_n)               # (N, H)
        edge = mlp2(ea_ref[...], enc_e)              # (E, H)

        # ---- process: n_blocks GNN blocks, unrolled, all-resident -----------
        for blk in blocks:
            (we1a, we1b, we1c, be1, we2, be2,
             wn1a, wn1b, bn1, wn2, bn2) = blk

            # gather node features per edge (x_i = target, x_j = source)
            x_i = _dot(sdst, node)                   # (E, H)
            x_j = _dot(ssrc, node)                   # (E, H)

            # edge / message MLP: split partial dots replace concat([xi,xj,e])
            h = (_dot(x_i, we1a[...]) + _dot(x_j, we1b[...])
                 + _dot(edge, we1c[...]) + be1[...])
            h = _leaky_relu(h)
            msg = _dot(h, we2[...]) + be2[...]       # (E, H)

            # scatter-mean of messages into target nodes
            aggr = _dot(sdst_t, msg) * inv_deg       # (N, H)

            # node MLP: split partial dots replace concat([x, aggr])
            hn = _dot(node, wn1a[...]) + _dot(aggr, wn1b[...]) + bn1[...]
            hn = _leaky_relu(hn)
            node_upd = _dot(hn, wn2[...]) + bn2[...]

            # residuals
            node = node_upd + node
            edge = msg + edge

        # ---- decode: per-node output ----------------------------------------
        y_ref[...] = mlp2(node, dec_n).astype(y_ref.dtype)

        # ---- decode: global output (SoftmaxAggregation(learn=True) + MLP) ---
        t = t_ref[0, 0]                              # scalar from SMEM
        z = node * t
        m = jnp.max(z, axis=0, keepdims=True)
        e = jnp.exp(z - m)
        alpha = e * pl.reciprocal(jnp.sum(e, axis=0, keepdims=True), approx=True)
        g = jnp.sum(alpha * node, axis=0, keepdims=True)   # (1, H)

        w1, b1, w2, b2, w3, b3 = dec_g
        hg = _leaky_relu(_dot(g, w1[...]) + b1[...])
        hg = _leaky_relu(_dot(hg, w2[...]) + b2[...])
        glob_ref[...] = (_dot(hg, w3[...]) + b3[...]).astype(glob_ref.dtype)

    return kernel


# ----------------------------------------------------------------------------
# parameter initialization (deterministic, synthetic)
# ----------------------------------------------------------------------------

def _linear(key, fan_in, fan_out):
    kw, kb = jax.random.split(key)
    scale = 1.0 / jnp.sqrt(jnp.float32(fan_in))
    w = jax.random.normal(kw, (fan_in, fan_out), jnp.float32) * scale
    b = jax.random.normal(kb, (1, fan_out), jnp.float32) * 0.01
    return w, b


def _mini_mlp_params(key, inputs, targets, hidden):
    """MiniMLP(inputs, targets, hidden) -> flat tuple (w1, b1, w2, b2, ...)."""
    dims = [inputs] + list(hidden) + [targets]
    keys = jax.random.split(key, len(dims) - 1)
    params = []
    for k, din, dout in zip(keys, dims[:-1], dims[1:]):
        w, b = _linear(k, din, dout)
        params += [w, b]
    return tuple(params)


def init_encode_process_decode(key, node_features, edge_features,
                               hidden_features, n_blocks, out_nodes, out_glob):
    keys = jax.random.split(key, 5 + 2 * n_blocks)
    params = {
        "encoder_nodes": _mini_mlp_params(keys[0], node_features,
                                          hidden_features, [hidden_features]),
        "encoder_edges": _mini_mlp_params(keys[1], edge_features,
                                          hidden_features, [hidden_features]),
        "decoder_nodes": _mini_mlp_params(keys[2], hidden_features,
                                          out_nodes, [hidden_features]),
        "decoder_glob": _mini_mlp_params(keys[3], hidden_features, out_glob,
                                         [hidden_features, hidden_features]),
        "node2glob_t": jnp.ones((1, 1), jnp.float32),  # SoftmaxAggregation t=1
        "blocks": [],
    }
    for b in range(n_blocks):
        ke, kn = jax.random.split(keys[5 + b])
        edge_mlp = _mini_mlp_params(ke, hidden_features + 2 * hidden_features,
                                    hidden_features, [hidden_features])
        node_mlp = _mini_mlp_params(kn, hidden_features + hidden_features,
                                    hidden_features, [hidden_features])
        params["blocks"].append((edge_mlp, node_mlp))
    return params


# ----------------------------------------------------------------------------
# full forward pass (single fused pallas_call)
# ----------------------------------------------------------------------------

@functools.partial(jax.jit, static_argnames=("num_nodes",))
def encode_process_decode(params, x, edge_index, edge_attr, num_nodes):
    """Forward pass of EncodeProcessDecode (dropout=False, single graph).

    Returns (y, glob_out) like the PyTorch module.
    """
    H = params["encoder_nodes"][2].shape[1]          # hidden_features (static)
    n_blocks = len(params["blocks"])
    out_nodes = params["decoder_nodes"][-1].shape[1]
    out_glob = params["decoder_glob"][-1].shape[1]

    # one-hot selection matrices & loop-invariant scatter-mean scaling
    # (plain-JAX glue; all matmuls happen in-kernel)
    # TODO(synk): for realistic N/E, replace dense one-hot selectors with
    # scalar-prefetched index gather (PrefetchScalarGridSpec) to stay O(E*H).
    ssrc = jax.nn.one_hot(edge_index[0], num_nodes, dtype=jnp.float32)  # (E, N)
    sdst = jax.nn.one_hot(edge_index[1], num_nodes, dtype=jnp.float32)  # (E, N)
    sdst_t = sdst.T                                                     # (N, E)
    deg = jnp.sum(sdst, axis=0).reshape(num_nodes, 1)
    inv_deg = 1.0 / jnp.maximum(deg, 1.0)            # torch_scatter mean clamp

    # flat argument list for the fused kernel (block first-layer weights
    # pre-split so no concat / in-kernel slicing is needed)
    flat_inputs = [x, edge_attr, sdst, ssrc, sdst_t, inv_deg,
                   params["node2glob_t"]]
    flat_inputs += list(params["encoder_nodes"])
    flat_inputs += list(params["encoder_edges"])
    for edge_mlp, node_mlp in params["blocks"]:
        we1, be1, we2, be2 = edge_mlp                # we1: (3H, H)
        wn1, bn1, wn2, bn2 = node_mlp                # wn1: (2H, H)
        flat_inputs += [we1[:H], we1[H:2 * H], we1[2 * H:], be1, we2, be2,
                        wn1[:H], wn1[H:], bn1, wn2, bn2]
    flat_inputs += list(params["decoder_nodes"])
    flat_inputs += list(params["decoder_glob"])

    in_specs = [pl.BlockSpec(memory_space=pltpu.MemorySpace.VMEM)
                for _ in flat_inputs]
    in_specs[6] = pl.BlockSpec(memory_space=pltpu.MemorySpace.SMEM)  # temp. t

    y, glob_out = pl.pallas_call(
        _make_fused_kernel(n_blocks),
        out_shape=(jax.ShapeDtypeStruct((num_nodes, out_nodes), jnp.float32),
                   jax.ShapeDtypeStruct((1, out_glob), jnp.float32)),
        in_specs=in_specs,
        out_specs=(pl.BlockSpec(memory_space=pltpu.MemorySpace.VMEM),
                   pl.BlockSpec(memory_space=pltpu.MemorySpace.VMEM)),
    )(*flat_inputs)

    # TODO(synk): data.batch with multiple graphs would need segment-wise
    # softmax aggregation; here batch == 0 for all nodes (single graph).
    return y, glob_out


# ----------------------------------------------------------------------------
# main
# ----------------------------------------------------------------------------

if __name__ == "__main__":
    node_features = 4
    edge_features = 3
    hidden_features = 32
    n_blocks = 2
    out_nodes = 2
    out_glob = 1

    N = 16   # nodes
    E = 48   # edges

    key = jax.random.PRNGKey(0)
    k_par, k_x, k_ea, k_ei = jax.random.split(key, 4)

    params = init_encode_process_decode(k_par, node_features, edge_features,
                                        hidden_features, n_blocks,
                                        out_nodes, out_glob)

    x = jax.random.normal(k_x, (N, node_features), jnp.float32)
    edge_attr = jax.random.normal(k_ea, (E, edge_features), jnp.float32)
    edge_index = jax.random.randint(k_ei, (2, E), 0, N, dtype=jnp.int32)

    y, glob_out = encode_process_decode(params, x, edge_index, edge_attr,
                                        num_nodes=N)
    jax.block_until_ready((y, glob_out))

    assert y.shape == (N, out_nodes)
    assert glob_out.shape == (1, out_glob)
    assert bool(jnp.all(jnp.isfinite(y))) and bool(jnp.all(jnp.isfinite(glob_out)))
    print("KERNEL_OK")
</pallas_src>

<mosaic_0001>
module attributes {stable_mosaic.version = 11 : i64} {
  func.func @kernel(%arg0: memref<16x4xf32, #tpu.memory_space<vmem>>, %arg1: memref<48x3xf32, #tpu.memory_space<vmem>>, %arg2: memref<48x16xf32, #tpu.memory_space<vmem>>, %arg3: memref<48x16xf32, #tpu.memory_space<vmem>>, %arg4: memref<16x48xf32, #tpu.memory_space<vmem>>, %arg5: memref<16x1xf32, #tpu.memory_space<vmem>>, %arg6: memref<1x1xf32, #tpu.memory_space<smem>>, %arg7: memref<4x32xf32, #tpu.memory_space<vmem>>, %arg8: memref<1x32xf32, #tpu.memory_space<vmem>>, %arg9: memref<32x32xf32, #tpu.memory_space<vmem>>, %arg10: memref<1x32xf32, #tpu.memory_space<vmem>>, %arg11: memref<3x32xf32, #tpu.memory_space<vmem>>, %arg12: memref<1x32xf32, #tpu.memory_space<vmem>>, %arg13: memref<32x32xf32, #tpu.memory_space<vmem>>, %arg14: memref<1x32xf32, #tpu.memory_space<vmem>>, %arg15: memref<32x32xf32, #tpu.memory_space<vmem>>, %arg16: memref<32x32xf32, #tpu.memory_space<vmem>>, %arg17: memref<32x32xf32, #tpu.memory_space<vmem>>, %arg18: memref<1x32xf32, #tpu.memory_space<vmem>>, %arg19: memref<32x32xf32, #tpu.memory_space<vmem>>, %arg20: memref<1x32xf32, #tpu.memory_space<vmem>>, %arg21: memref<32x32xf32, #tpu.memory_space<vmem>>, %arg22: memref<32x32xf32, #tpu.memory_space<vmem>>, %arg23: memref<1x32xf32, #tpu.memory_space<vmem>>, %arg24: memref<32x32xf32, #tpu.memory_space<vmem>>, %arg25: memref<1x32xf32, #tpu.memory_space<vmem>>, %arg26: memref<32x32xf32, #tpu.memory_space<vmem>>, %arg27: memref<32x32xf32, #tpu.memory_space<vmem>>, %arg28: memref<32x32xf32, #tpu.memory_space<vmem>>, %arg29: memref<1x32xf32, #tpu.memory_space<vmem>>, %arg30: memref<32x32xf32, #tpu.memory_space<vmem>>, %arg31: memref<1x32xf32, #tpu.memory_space<vmem>>, %arg32: memref<32x32xf32, #tpu.memory_space<vmem>>, %arg33: memref<32x32xf32, #tpu.memory_space<vmem>>, %arg34: memref<1x32xf32, #tpu.memory_space<vmem>>, %arg35: memref<32x32xf32, #tpu.memory_space<vmem>>, %arg36: memref<1x32xf32, #tpu.memory_space<vmem>>, %arg37: memref<32x32xf32, #tpu.memory_space<vmem>>, %arg38: memref<1x32xf32, #tpu.memory_space<vmem>>, %arg39: memref<32x2xf32, #tpu.memory_space<vmem>>, %arg40: memref<1x2xf32, #tpu.memory_space<vmem>>, %arg41: memref<32x32xf32, #tpu.memory_space<vmem>>, %arg42: memref<1x32xf32, #tpu.memory_space<vmem>>, %arg43: memref<32x32xf32, #tpu.memory_space<vmem>>, %arg44: memref<1x32xf32, #tpu.memory_space<vmem>>, %arg45: memref<32x1xf32, #tpu.memory_space<vmem>>, %arg46: memref<1x1xf32, #tpu.memory_space<vmem>>, %arg47: memref<16x2xf32, #tpu.memory_space<vmem>>, %arg48: memref<1x1xf32, #tpu.memory_space<vmem>>) attributes {dimension_semantics = [], scalar_prefetch = 0 : i64, scratch_operands = 0 : i64, tpu.core_type = #tpu.core_type<tc>} {
    %c0 = arith.constant 0 : index
    %c0_0 = arith.constant 0 : index
    %0 = vector.load %arg2[%c0, %c0_0] : memref<48x16xf32, #tpu.memory_space<vmem>>, vector<48x16xf32>
    %c0_1 = arith.constant 0 : index
    %c0_2 = arith.constant 0 : index
    %1 = vector.load %arg3[%c0_1, %c0_2] : memref<48x16xf32, #tpu.memory_space<vmem>>, vector<48x16xf32>
    %c0_3 = arith.constant 0 : index
    %c0_4 = arith.constant 0 : index
    %2 = vector.load %arg4[%c0_3, %c0_4] : memref<16x48xf32, #tpu.memory_space<vmem>>, vector<16x48xf32>
    %c0_5 = arith.constant 0 : index
    %c0_6 = arith.constant 0 : index
    %3 = vector.load %arg5[%c0_5, %c0_6] : memref<16x1xf32, #tpu.memory_space<vmem>>, vector<16x1xf32>
    %c0_7 = arith.constant 0 : index
    %c0_8 = arith.constant 0 : index
    %4 = vector.load %arg0[%c0_7, %c0_8] : memref<16x4xf32, #tpu.memory_space<vmem>>, vector<16x4xf32>
    %c0_9 = arith.constant 0 : index
    %c0_10 = arith.constant 0 : index
    %5 = vector.load %arg7[%c0_9, %c0_10] : memref<4x32xf32, #tpu.memory_space<vmem>>, vector<4x32xf32>
    %cst = arith.constant dense<0.000000e+00> : vector<16x32xf32>
    %6 = tpu.matmul %4, %5, %cst {dimension_numbers = #tpu.dot_dimension_numbers<[1], [0], [0], [1], [0, 0, 1, 1], [], []>} : vector<16x4xf32>, vector<4x32xf32>, vector<16x32xf32> -> vector<16x32xf32>
    %c0_11 = arith.constant 0 : index
    %c0_12 = arith.constant 0 : index
    %7 = vector.load %arg8[%c0_11, %c0_12] : memref<1x32xf32, #tpu.memory_space<vmem>>, vector<1x32xf32>
    %8 = vector.broadcast %7 : vector<1x32xf32> to vector<16x32xf32>
    %9 = arith.addf %6, %8 : vector<16x32xf32>
    %cst_13 = arith.constant 0.000000e+00 : f32
    %10 = vector.broadcast %cst_13 : f32 to vector<16x32xf32>
    %11 = arith.cmpf ogt, %9, %10 : vector<16x32xf32>
    %cst_14 = arith.constant 0.00999999977 : f32
    %12 = vector.broadcast %cst_14 : f32 to vector<16x32xf32>
    %13 = arith.mulf %12, %9 : vector<16x32xf32>
    %14 = arith.select %11, %9, %13 : vector<16x32xi1>, vector<16x32xf32>
    %c0_15 = arith.constant 0 : index
    %c0_16 = arith.constant 0 : index
    %15 = vector.load %arg9[%c0_15, %c0_16] : memref<32x32xf32, #tpu.memory_space<vmem>>, vector<32x32xf32>
    %cst_17 = arith.constant dense<0.000000e+00> : vector<16x32xf32>
    %16 = tpu.matmul %14, %15, %cst_17 {dimension_numbers = #tpu.dot_dimension_numbers<[1], [0], [0], [1], [0, 0, 1, 1], [], []>} : vector<16x32xf32>, vector<32x32xf32>, vector<16x32xf32> -> vector<16x32xf32>
    %c0_18 = arith.constant 0 : index
    %c0_19 = arith.constant 0 : index
    %17 = vector.load %arg10[%c0_18, %c0_19] : memref<1x32xf32, #tpu.memory_space<vmem>>, vector<1x32xf32>
    %18 = vector.broadcast %17 : vector<1x32xf32> to vector<16x32xf32>
    %19 = arith.addf %16, %18 : vector<16x32xf32>
    %c0_20 = arith.constant 0 : index
    %c0_21 = arith.constant 0 : index
    %20 = vector.load %arg1[%c0_20, %c0_21] : memref<48x3xf32, #tpu.memory_space<vmem>>, vector<48x3xf32>
    %c0_22 = arith.constant 0 : index
    %c0_23 = arith.constant 0 : index
    %21 = vector.load %arg11[%c0_22, %c0_23] : memref<3x32xf32, #tpu.memory_space<vmem>>, vector<3x32xf32>
    %cst_24 = arith.constant dense<0.000000e+00> : vector<48x32xf32>
    %22 = tpu.matmul %20, %21, %cst_24 {dimension_numbers = #tpu.dot_dimension_numbers<[1], [0], [0], [1], [0, 0, 1, 1], [], []>} : vector<48x3xf32>, vector<3x32xf32>, vector<48x32xf32> -> vector<48x32xf32>
    %c0_25 = arith.constant 0 : index
    %c0_26 = arith.constant 0 : index
    %23 = vector.load %arg12[%c0_25, %c0_26] : memref<1x32xf32, #tpu.memory_space<vmem>>, vector<1x32xf32>
    %24 = vector.broadcast %23 : vector<1x32xf32> to vector<48x32xf32>
    %25 = arith.addf %22, %24 : vector<48x32xf32>
    %cst_27 = arith.constant 0.000000e+00 : f32
    %26 = vector.broadcast %cst_27 : f32 to vector<48x32xf32>
    %27 = arith.cmpf ogt, %25, %26 : vector<48x32xf32>
    %cst_28 = arith.constant 0.00999999977 : f32
    %28 = vector.broadcast %cst_28 : f32 to vector<48x32xf32>
    %29 = arith.mulf %28, %25 : vector<48x32xf32>
    %30 = arith.select %27, %25, %29 : vector<48x32xi1>, vector<48x32xf32>
    %c0_29 = arith.constant 0 : index
    %c0_30 = arith.constant 0 : index
    %31 = vector.load %arg13[%c0_29, %c0_30] : memref<32x32xf32, #tpu.memory_space<vmem>>, vector<32x32xf32>
    %cst_31 = arith.constant dense<0.000000e+00> : vector<48x32xf32>
    %32 = tpu.matmul %30, %31, %cst_31 {dimension_numbers = #tpu.dot_dimension_numbers<[1], [0], [0], [1], [0, 0, 1, 1], [], []>} : vector<48x32xf32>, vector<32x32xf32>, vector<48x32xf32> -> vector<48x32xf32>
    %c0_32 = arith.constant 0 : index
    %c0_33 = arith.constant 0 : index
    %33 = vector.load %arg14[%c0_32, %c0_33] : memref<1x32xf32, #tpu.memory_space<vmem>>, vector<1x32xf32>
    %34 = vector.broadcast %33 : vector<1x32xf32> to vector<48x32xf32>
    %35 = arith.addf %32, %34 : vector<48x32xf32>
    %cst_34 = arith.constant dense<0.000000e+00> : vector<48x32xf32>
    %36 = tpu.matmul %0, %19, %cst_34 {dimension_numbers = #tpu.dot_dimension_numbers<[1], [0], [0], [1], [0, 0, 1, 1], [], []>} : vector<48x16xf32>, vector<16x32xf32>, vector<48x32xf32> -> vector<48x32xf32>
    %cst_35 = arith.constant dense<0.000000e+00> : vector<48x32xf32>
    %37 = tpu.matmul %1, %19, %cst_35 {dimension_numbers = #tpu.dot_dimension_numbers<[1], [0], [0], [1], [0, 0, 1, 1], [], []>} : vector<48x16xf32>, vector<16x32xf32>, vector<48x32xf32> -> vector<48x32xf32>
    %c0_36 = arith.constant 0 : index
    %c0_37 = arith.constant 0 : index
    %38 = vector.load %arg15[%c0_36, %c0_37] : memref<32x32xf32, #tpu.memory_space<vmem>>, vector<32x32xf32>
    %cst_38 = arith.constant dense<0.000000e+00> : vector<48x32xf32>
    %39 = tpu.matmul %36, %38, %cst_38 {dimension_numbers = #tpu.dot_dimension_numbers<[1], [0], [0], [1], [0, 0, 1, 1], [], []>} : vector<48x32xf32>, vector<32x32xf32>, vector<48x32xf32> -> vector<48x32xf32>
    %c0_39 = arith.constant 0 : index
    %c0_40 = arith.constant 0 : index
    %40 = vector.load %arg16[%c0_39, %c0_40] : memref<32x32xf32, #tpu.memory_space<vmem>>, vector<32x32xf32>
    %cst_41 = arith.constant dense<0.000000e+00> : vector<48x32xf32>
    %41 = tpu.matmul %37, %40, %cst_41 {dimension_numbers = #tpu.dot_dimension_numbers<[1], [0], [0], [1], [0, 0, 1, 1], [], []>} : vector<48x32xf32>, vector<32x32xf32>, vector<48x32xf32> -> vector<48x32xf32>
    %42 = arith.addf %39, %41 : vector<48x32xf32>
    %c0_42 = arith.constant 0 : index
    %c0_43 = arith.constant 0 : index
    %43 = vector.load %arg17[%c0_42, %c0_43] : memref<32x32xf32, #tpu.memory_space<vmem>>, vector<32x32xf32>
    %cst_44 = arith.constant dense<0.000000e+00> : vector<48x32xf32>
    %44 = tpu.matmul %35, %43, %cst_44 {dimension_numbers = #tpu.dot_dimension_numbers<[1], [0], [0], [1], [0, 0, 1, 1], [], []>} : vector<48x32xf32>, vector<32x32xf32>, vector<48x32xf32> -> vector<48x32xf32>
    %45 = arith.addf %42, %44 : vector<48x32xf32>
    %c0_45 = arith.constant 0 : index
    %c0_46 = arith.constant 0 : index
    %46 = vector.load %arg18[%c0_45, %c0_46] : memref<1x32xf32, #tpu.memory_space<vmem>>, vector<1x32xf32>
    %47 = vector.broadcast %46 : vector<1x32xf32> to vector<48x32xf32>
    %48 = arith.addf %45, %47 : vector<48x32xf32>
    %cst_47 = arith.constant 0.000000e+00 : f32
    %49 = vector.broadcast %cst_47 : f32 to vector<48x32xf32>
    %50 = arith.cmpf ogt, %48, %49 : vector<48x32xf32>
    %cst_48 = arith.constant 0.00999999977 : f32
    %51 = vector.broadcast %cst_48 : f32 to vector<48x32xf32>
    %52 = arith.mulf %51, %48 : vector<48x32xf32>
    %53 = arith.select %50, %48, %52 : vector<48x32xi1>, vector<48x32xf32>
    %c0_49 = arith.constant 0 : index
    %c0_50 = arith.constant 0 : index
    %54 = vector.load %arg19[%c0_49, %c0_50] : memref<32x32xf32, #tpu.memory_space<vmem>>, vector<32x32xf32>
    %cst_51 = arith.constant dense<0.000000e+00> : vector<48x32xf32>
    %55 = tpu.matmul %53, %54, %cst_51 {dimension_numbers = #tpu.dot_dimension_numbers<[1], [0], [0], [1], [0, 0, 1, 1], [], []>} : vector<48x32xf32>, vector<32x32xf32>, vector<48x32xf32> -> vector<48x32xf32>
    %c0_52 = arith.constant 0 : index
    %c0_53 = arith.constant 0 : index
    %56 = vector.load %arg20[%c0_52, %c0_53] : memref<1x32xf32, #tpu.memory_space<vmem>>, vector<1x32xf32>
    %57 = vector.broadcast %56 : vector<1x32xf32> to vector<48x32xf32>
    %58 = arith.addf %55, %57 : vector<48x32xf32>
    %cst_54 = arith.constant dense<0.000000e+00> : vector<16x32xf32>
    %59 = tpu.matmul %2, %58, %cst_54 {dimension_numbers = #tpu.dot_dimension_numbers<[1], [0], [0], [1], [0, 0, 1, 1], [], []>} : vector<16x48xf32>, vector<48x32xf32>, vector<16x32xf32> -> vector<16x32xf32>
    %60 = vector.broadcast %3 : vector<16x1xf32> to vector<16x32xf32>
    %61 = arith.mulf %59, %60 : vector<16x32xf32>
    %c0_55 = arith.constant 0 : index
    %c0_56 = arith.constant 0 : index
    %62 = vector.load %arg21[%c0_55, %c0_56] : memref<32x32xf32, #tpu.memory_space<vmem>>, vector<32x32xf32>
    %cst_57 = arith.constant dense<0.000000e+00> : vector<16x32xf32>
    %63 = tpu.matmul %19, %62, %cst_57 {dimension_numbers = #tpu.dot_dimension_numbers<[1], [0], [0], [1], [0, 0, 1, 1], [], []>} : vector<16x32xf32>, vector<32x32xf32>, vector<16x32xf32> -> vector<16x32xf32>
    %c0_58 = arith.constant 0 : index
    %c0_59 = arith.constant 0 : index
    %64 = vector.load %arg22[%c0_58, %c0_59] : memref<32x32xf32, #tpu.memory_space<vmem>>, vector<32x32xf32>
    %cst_60 = arith.constant dense<0.000000e+00> : vector<16x32xf32>
    %65 = tpu.matmul %61, %64, %cst_60 {dimension_numbers = #tpu.dot_dimension_numbers<[1], [0], [0], [1], [0, 0, 1, 1], [], []>} : vector<16x32xf32>, vector<32x32xf32>, vector<16x32xf32> -> vector<16x32xf32>
    %66 = arith.addf %63, %65 : vector<16x32xf32>
    %c0_61 = arith.constant 0 : index
    %c0_62 = arith.constant 0 : index
    %67 = vector.load %arg23[%c0_61, %c0_62] : memref<1x32xf32, #tpu.memory_space<vmem>>, vector<1x32xf32>
    %68 = vector.broadcast %67 : vector<1x32xf32> to vector<16x32xf32>
    %69 = arith.addf %66, %68 : vector<16x32xf32>
    %cst_63 = arith.constant 0.000000e+00 : f32
    %70 = vector.broadcast %cst_63 : f32 to vector<16x32xf32>
    %71 = arith.cmpf ogt, %69, %70 : vector<16x32xf32>
    %cst_64 = arith.constant 0.00999999977 : f32
    %72 = vector.broadcast %cst_64 : f32 to vector<16x32xf32>
    %73 = arith.mulf %72, %69 : vector<16x32xf32>
    %74 = arith.select %71, %69, %73 : vector<16x32xi1>, vector<16x32xf32>
    %c0_65 = arith.constant 0 : index
    %c0_66 = arith.constant 0 : index
    %75 = vector.load %arg24[%c0_65, %c0_66] : memref<32x32xf32, #tpu.memory_space<vmem>>, vector<32x32xf32>
    %cst_67 = arith.constant dense<0.000000e+00> : vector<16x32xf32>
    %76 = tpu.matmul %74, %75, %cst_67 {dimension_numbers = #tpu.dot_dimension_numbers<[1], [0], [0], [1], [0, 0, 1, 1], [], []>} : vector<16x32xf32>, vector<32x32xf32>, vector<16x32xf32> -> vector<16x32xf32>
    %c0_68 = arith.constant 0 : index
    %c0_69 = arith.constant 0 : index
    %77 = vector.load %arg25[%c0_68, %c0_69] : memref<1x32xf32, #tpu.memory_space<vmem>>, vector<1x32xf32>
    %78 = vector.broadcast %77 : vector<1x32xf32> to vector<16x32xf32>
    %79 = arith.addf %76, %78 : vector<16x32xf32>
    %80 = arith.addf %79, %19 : vector<16x32xf32>
    %81 = arith.addf %58, %35 : vector<48x32xf32>
    %cst_70 = arith.constant dense<0.000000e+00> : vector<48x32xf32>
    %82 = tpu.matmul %0, %80, %cst_70 {dimension_numbers = #tpu.dot_dimension_numbers<[1], [0], [0], [1], [0, 0, 1, 1], [], []>} : vector<48x16xf32>, vector<16x32xf32>, vector<48x32xf32> -> vector<48x32xf32>
    %cst_71 = arith.constant dense<0.000000e+00> : vector<48x32xf32>
    %83 = tpu.matmul %1, %80, %cst_71 {dimension_numbers = #tpu.dot_dimension_numbers<[1], [0], [0], [1], [0, 0, 1, 1], [], []>} : vector<48x16xf32>, vector<16x32xf32>, vector<48x32xf32> -> vector<48x32xf32>
    %c0_72 = arith.constant 0 : index
    %c0_73 = arith.constant 0 : index
    %84 = vector.load %arg26[%c0_72, %c0_73] : memref<32x32xf32, #tpu.memory_space<vmem>>, vector<32x32xf32>
    %cst_74 = arith.constant dense<0.000000e+00> : vector<48x32xf32>
    %85 = tpu.matmul %82, %84, %cst_74 {dimension_numbers = #tpu.dot_dimension_numbers<[1], [0], [0], [1], [0, 0, 1, 1], [], []>} : vector<48x32xf32>, vector<32x32xf32>, vector<48x32xf32> -> vector<48x32xf32>
    %c0_75 = arith.constant 0 : index
    %c0_76 = arith.constant 0 : index
    %86 = vector.load %arg27[%c0_75, %c0_76] : memref<32x32xf32, #tpu.memory_space<vmem>>, vector<32x32xf32>
    %cst_77 = arith.constant dense<0.000000e+00> : vector<48x32xf32>
    %87 = tpu.matmul %83, %86, %cst_77 {dimension_numbers = #tpu.dot_dimension_numbers<[1], [0], [0], [1], [0, 0, 1, 1], [], []>} : vector<48x32xf32>, vector<32x32xf32>, vector<48x32xf32> -> vector<48x32xf32>
    %88 = arith.addf %85, %87 : vector<48x32xf32>
    %c0_78 = arith.constant 0 : index
    %c0_79 = arith.constant 0 : index
    %89 = vector.load %arg28[%c0_78, %c0_79] : memref<32x32xf32, #tpu.memory_space<vmem>>, vector<32x32xf32>
    %cst_80 = arith.constant dense<0.000000e+00> : vector<48x32xf32>
    %90 = tpu.matmul %81, %89, %cst_80 {dimension_numbers = #tpu.dot_dimension_numbers<[1], [0], [0], [1], [0, 0, 1, 1], [], []>} : vector<48x32xf32>, vector<32x32xf32>, vector<48x32xf32> -> vector<48x32xf32>
    %91 = arith.addf %88, %90 : vector<48x32xf32>
    %c0_81 = arith.constant 0 : index
    %c0_82 = arith.constant 0 : index
    %92 = vector.load %arg29[%c0_81, %c0_82] : memref<1x32xf32, #tpu.memory_space<vmem>>, vector<1x32xf32>
    %93 = vector.broadcast %92 : vector<1x32xf32> to vector<48x32xf32>
    %94 = arith.addf %91, %93 : vector<48x32xf32>
    %cst_83 = arith.constant 0.000000e+00 : f32
    %95 = vector.broadcast %cst_83 : f32 to vector<48x32xf32>
    %96 = arith.cmpf ogt, %94, %95 : vector<48x32xf32>
    %cst_84 = arith.constant 0.00999999977 : f32
    %97 = vector.broadcast %cst_84 : f32 to vector<48x32xf32>
    %98 = arith.mulf %97, %94 : vector<48x32xf32>
    %99 = arith.select %96, %94, %98 : vector<48x32xi1>, vector<48x32xf32>
    %c0_85 = arith.constant 0 : index
    %c0_86 = arith.constant 0 : index
    %100 = vector.load %arg30[%c0_85, %c0_86] : memref<32x32xf32, #tpu.memory_space<vmem>>, vector<32x32xf32>
    %cst_87 = arith.constant dense<0.000000e+00> : vector<48x32xf32>
    %101 = tpu.matmul %99, %100, %cst_87 {dimension_numbers = #tpu.dot_dimension_numbers<[1], [0], [0], [1], [0, 0, 1, 1], [], []>} : vector<48x32xf32>, vector<32x32xf32>, vector<48x32xf32> -> vector<48x32xf32>
    %c0_88 = arith.constant 0 : index
    %c0_89 = arith.constant 0 : index
    %102 = vector.load %arg31[%c0_88, %c0_89] : memref<1x32xf32, #tpu.memory_space<vmem>>, vector<1x32xf32>
    %103 = vector.broadcast %102 : vector<1x32xf32> to vector<48x32xf32>
    %104 = arith.addf %101, %103 : vector<48x32xf32>
    %cst_90 = arith.constant dense<0.000000e+00> : vector<16x32xf32>
    %105 = tpu.matmul %2, %104, %cst_90 {dimension_numbers = #tpu.dot_dimension_numbers<[1], [0], [0], [1], [0, 0, 1, 1], [], []>} : vector<16x48xf32>, vector<48x32xf32>, vector<16x32xf32> -> vector<16x32xf32>
    %106 = vector.broadcast %3 : vector<16x1xf32> to vector<16x32xf32>
    %107 = arith.mulf %105, %106 : vector<16x32xf32>
    %c0_91 = arith.constant 0 : index
    %c0_92 = arith.constant 0 : index
    %108 = vector.load %arg32[%c0_91, %c0_92] : memref<32x32xf32, #tpu.memory_space<vmem>>, vector<32x32xf32>
    %cst_93 = arith.constant dense<0.000000e+00> : vector<16x32xf32>
    %109 = tpu.matmul %80, %108, %cst_93 {dimension_numbers = #tpu.dot_dimension_numbers<[1], [0], [0], [1], [0, 0, 1, 1], [], []>} : vector<16x32xf32>, vector<32x32xf32>, vector<16x32xf32> -> vector<16x32xf32>
    %c0_94 = arith.constant 0 : index
    %c0_95 = arith.constant 0 : index
    %110 = vector.load %arg33[%c0_94, %c0_95] : memref<32x32xf32, #tpu.memory_space<vmem>>, vector<32x32xf32>
    %cst_96 = arith.constant dense<0.000000e+00> : vector<16x32xf32>
    %111 = tpu.matmul %107, %110, %cst_96 {dimension_numbers = #tpu.dot_dimension_numbers<[1], [0], [0], [1], [0, 0, 1, 1], [], []>} : vector<16x32xf32>, vector<32x32xf32>, vector<16x32xf32> -> vector<16x32xf32>
    %112 = arith.addf %109, %111 : vector<16x32xf32>
    %c0_97 = arith.constant 0 : index
    %c0_98 = arith.constant 0 : index
    %113 = vector.load %arg34[%c0_97, %c0_98] : memref<1x32xf32, #tpu.memory_space<vmem>>, vector<1x32xf32>
    %114 = vector.broadcast %113 : vector<1x32xf32> to vector<16x32xf32>
    %115 = arith.addf %112, %114 : vector<16x32xf32>
    %cst_99 = arith.constant 0.000000e+00 : f32
    %116 = vector.broadcast %cst_99 : f32 to vector<16x32xf32>
    %117 = arith.cmpf ogt, %115, %116 : vector<16x32xf32>
    %cst_100 = arith.constant 0.00999999977 : f32
    %118 = vector.broadcast %cst_100 : f32 to vector<16x32xf32>
    %119 = arith.mulf %118, %115 : vector<16x32xf32>
    %120 = arith.select %117, %115, %119 : vector<16x32xi1>, vector<16x32xf32>
    %c0_101 = arith.constant 0 : index
    %c0_102 = arith.constant 0 : index
    %121 = vector.load %arg35[%c0_101, %c0_102] : memref<32x32xf32, #tpu.memory_space<vmem>>, vector<32x32xf32>
    %cst_103 = arith.constant dense<0.000000e+00> : vector<16x32xf32>
    %122 = tpu.matmul %120, %121, %cst_103 {dimension_numbers = #tpu.dot_dimension_numbers<[1], [0], [0], [1], [0, 0, 1, 1], [], []>} : vector<16x32xf32>, vector<32x32xf32>, vector<16x32xf32> -> vector<16x32xf32>
    %c0_104 = arith.constant 0 : index
    %c0_105 = arith.constant 0 : index
    %123 = vector.load %arg36[%c0_104, %c0_105] : memref<1x32xf32, #tpu.memory_space<vmem>>, vector<1x32xf32>
    %124 = vector.broadcast %123 : vector<1x32xf32> to vector<16x32xf32>
    %125 = arith.addf %122, %124 : vector<16x32xf32>
    %126 = arith.addf %125, %80 : vector<16x32xf32>
    %c0_106 = arith.constant 0 : index
    %c0_107 = arith.constant 0 : index
    %127 = vector.load %arg37[%c0_106, %c0_107] : memref<32x32xf32, #tpu.memory_space<vmem>>, vector<32x32xf32>
    %cst_108 = arith.constant dense<0.000000e+00> : vector<16x32xf32>
    %128 = tpu.matmul %126, %127, %cst_108 {dimension_numbers = #tpu.dot_dimension_numbers<[1], [0], [0], [1], [0, 0, 1, 1], [], []>} : vector<16x32xf32>, vector<32x32xf32>, vector<16x32xf32> -> vector<16x32xf32>
    %c0_109 = arith.constant 0 : index
    %c0_110 = arith.constant 0 : index
    %129 = vector.load %arg38[%c0_109, %c0_110] : memref<1x32xf32, #tpu.memory_space<vmem>>, vector<1x32xf32>
    %130 = vector.broadcast %129 : vector<1x32xf32> to vector<16x32xf32>
    %131 = arith.addf %128, %130 : vector<16x32xf32>
    %cst_111 = arith.constant 0.000000e+00 : f32
    %132 = vector.broadcast %cst_111 : f32 to vector<16x32xf32>
    %133 = arith.cmpf ogt, %131, %132 : vector<16x32xf32>
    %cst_112 = arith.constant 0.00999999977 : f32
    %134 = vector.broadcast %cst_112 : f32 to vector<16x32xf32>
    %135 = arith.mulf %134, %131 : vector<16x32xf32>
    %136 = arith.select %133, %131, %135 : vector<16x32xi1>, vector<16x32xf32>
    %c0_113 = arith.constant 0 : index
    %c0_114 = arith.constant 0 : index
    %137 = vector.load %arg39[%c0_113, %c0_114] : memref<32x2xf32, #tpu.memory_space<vmem>>, vector<32x2xf32>
    %cst_115 = arith.constant dense<0.000000e+00> : vector<16x2xf32>
    %138 = tpu.matmul %136, %137, %cst_115 {dimension_numbers = #tpu.dot_dimension_numbers<[1], [0], [0], [1], [0, 0, 1, 1], [], []>} : vector<16x32xf32>, vector<32x2xf32>, vector<16x2xf32> -> vector<16x2xf32>
    %c0_116 = arith.constant 0 : index
    %c0_117 = arith.constant 0 : index
    %139 = vector.load %arg40[%c0_116, %c0_117] : memref<1x2xf32, #tpu.memory_space<vmem>>, vector<1x2xf32>
    %140 = vector.broadcast %139 : vector<1x2xf32> to vector<16x2xf32>
    %141 = arith.addf %138, %140 : vector<16x2xf32>
    %c0_118 = arith.constant 0 : index
    %c0_119 = arith.constant 0 : index
    %142 = vector.load %arg47[%c0_118, %c0_119] : memref<16x2xf32, #tpu.memory_space<vmem>>, vector<16x2xf32>
    tpu.vector_store %arg47[%c0_118, %c0_119], %141 {strides = array<i32>} : memref<16x2xf32, #tpu.memory_space<vmem>>, vector<16x2xf32>,
    %c0_120 = arith.constant 0 : index
    %c0_121 = arith.constant 0 : index
    %143 = memref.load %arg6[%c0_120, %c0_121] : memref<1x1xf32, #tpu.memory_space<smem>>
    %144 = vector.broadcast %143 : f32 to vector<16x32xf32>
    %145 = arith.mulf %126, %144 : vector<16x32xf32>
    %cst_122 = arith.constant dense<0xFF800000> : vector<32xf32>
    %146 = vector.multi_reduction <maximumf>, %145, %cst_122 [0] : vector<16x32xf32> to vector<32xf32>
    %147 = vector.shape_cast %146 : vector<32xf32> to vector<1x32xf32>
    %148 = vector.broadcast %147 : vector<1x32xf32> to vector<16x32xf32>
    %149 = arith.subf %145, %148 : vector<16x32xf32>
    %150 = math.exp %149 : vector<16x32xf32>
    %cst_123 = arith.constant dense<0.000000e+00> : vector<32xf32>
    %151 = vector.multi_reduction <add>, %150, %cst_123 [0] : vector<16x32xf32> to vector<32xf32>
    %152 = vector.shape_cast %151 : vector<32xf32> to vector<1x32xf32>
    %153 = tpu.reciprocal %152 {approx = true} : vector<1x32xf32> -> vector<1x32xf32>
    %154 = vector.broadcast %153 : vector<1x32xf32> to vector<16x32xf32>
    %155 = arith.mulf %150, %154 : vector<16x32xf32>
    %156 = arith.mulf %155, %126 : vector<16x32xf32>
    %cst_124 = arith.constant dense<0.000000e+00> : vector<32xf32>
    %157 = vector.multi_reduction <add>, %156, %cst_124 [0] : vector<16x32xf32> to vector<32xf32>
    %158 = vector.shape_cast %157 : vector<32xf32> to vector<1x32xf32>
    %c0_125 = arith.constant 0 : index
    %c0_126 = arith.constant 0 : index
    %159 = vector.load %arg41[%c0_125, %c0_126] : memref<32x32xf32, #tpu.memory_space<vmem>>, vector<32x32xf32>
    %cst_127 = arith.constant dense<0.000000e+00> : vector<1x32xf32>
    %160 = tpu.matmul %158, %159, %cst_127 {dimension_numbers = #tpu.dot_dimension_numbers<[1], [0], [0], [1], [0, 0, 1, 1], [], []>} : vector<1x32xf32>, vector<32x32xf32>, vector<1x32xf32> -> vector<1x32xf32>
    %c0_128 = arith.constant 0 : index
    %c0_129 = arith.constant 0 : index
    %161 = vector.load %arg42[%c0_128, %c0_129] : memref<1x32xf32, #tpu.memory_space<vmem>>, vector<1x32xf32>
    %162 = arith.addf %160, %161 : vector<1x32xf32>
    %cst_130 = arith.constant 0.000000e+00 : f32
    %163 = vector.broadcast %cst_130 : f32 to vector<1x32xf32>
    %164 = arith.cmpf ogt, %162, %163 : vector<1x32xf32>
    %cst_131 = arith.constant 0.00999999977 : f32
    %165 = vector.broadcast %cst_131 : f32 to vector<1x32xf32>
    %166 = arith.mulf %165, %162 : vector<1x32xf32>
    %167 = arith.select %164, %162, %166 : vector<1x32xi1>, vector<1x32xf32>
    %c0_132 = arith.constant 0 : index
    %c0_133 = arith.constant 0 : index
    %168 = vector.load %arg43[%c0_132, %c0_133] : memref<32x32xf32, #tpu.memory_space<vmem>>, vector<32x32xf32>
    %cst_134 = arith.constant dense<0.000000e+00> : vector<1x32xf32>
    %169 = tpu.matmul %167, %168, %cst_134 {dimension_numbers = #tpu.dot_dimension_numbers<[1], [0], [0], [1], [0, 0, 1, 1], [], []>} : vector<1x32xf32>, vector<32x32xf32>, vector<1x32xf32> -> vector<1x32xf32>
    %c0_135 = arith.constant 0 : index
    %c0_136 = arith.constant 0 : index
    %170 = vector.load %arg44[%c0_135, %c0_136] : memref<1x32xf32, #tpu.memory_space<vmem>>, vector<1x32xf32>
    %171 = arith.addf %169, %170 : vector<1x32xf32>
    %cst_137 = arith.constant 0.000000e+00 : f32
    %172 = vector.broadcast %cst_137 : f32 to vector<1x32xf32>
    %173 = arith.cmpf ogt, %171, %172 : vector<1x32xf32>
    %cst_138 = arith.constant 0.00999999977 : f32
    %174 = vector.broadcast %cst_138 : f32 to vector<1x32xf32>
    %175 = arith.mulf %174, %171 : vector<1x32xf32>
    %176 = arith.select %173, %171, %175 : vector<1x32xi1>, vector<1x32xf32>
    %c0_139 = arith.constant 0 : index
    %c0_140 = arith.constant 0 : index
    %177 = vector.load %arg45[%c0_139, %c0_140] : memref<32x1xf32, #tpu.memory_space<vmem>>, vector<32x1xf32>
    %cst_141 = arith.constant dense<0.000000e+00> : vector<1x1xf32>
    %178 = tpu.matmul %176, %177, %cst_141 {dimension_numbers = #tpu.dot_dimension_numbers<[1], [0], [0], [1], [0, 0, 1, 1], [], []>} : vector<1x32xf32>, vector<32x1xf32>, vector<1x1xf32> -> vector<1x1xf32>
    %c0_142 = arith.constant 0 : index
    %c0_143 = arith.constant 0 : index
    %179 = vector.load %arg46[%c0_142, %c0_143] : memref<1x1xf32, #tpu.memory_space<vmem>>, vector<1x1xf32>
    %180 = arith.addf %178, %179 : vector<1x1xf32>
    %c0_144 = arith.constant 0 : index
    %c0_145 = arith.constant 0 : index
    %181 = vector.load %arg48[%c0_144, %c0_145] : memref<1x1xf32, #tpu.memory_space<vmem>>, vector<1x1xf32>
    tpu.vector_store %arg48[%c0_144, %c0_145], %180 {strides = array<i32>} : memref<1x1xf32, #tpu.memory_space<vmem>>, vector<1x1xf32>,
    return
  }
}

</mosaic_0001>

<bundles_post_ra>
// kernel: encode_process_decode.1
= control target key start
LH: loop header
LB: loop body
LE: loop exit
PB: predicated region body
PF: predicated region fallthrough
CT: control target
= control target key end

     0   :  { %s4213_s6 = smov 1   ;;  %s4214_s10 = smov 2   ;;  %s4926_s0 = inlined_call_operand.smem [shape: u32[49], index: -1, kind: input, shape index: {}] }
   0x1   :  { %s4273_s5 = sld [smem:[%s4926_s0]]   ;;  %s4215_s14 = smov 3  }
   0x2   :  { %s4278_s9 = sld [smem:[%s4926_s0 + %s4213_s6]]   ;;  %s4216_s18 = smov 4  }
   0x3   :  { %s4283_s13 = sld [smem:[%s4926_s0 + %s4214_s10]]   ;;  %s4217_s22 = smov 5  }
   0x4   :  { %s4288_s17 = sld [smem:[%s4926_s0 + %s4215_s14]]   ;;  %s4218_s26 = smov 6  }
   0x5   :  { %s4293_s21 = sld [smem:[%s4926_s0 + %s4216_s18]]   ;;  %s4219_s30 = smov 7  }
   0x6   :  { %s4298_s25 = sld [smem:[%s4926_s0 + %s4217_s22]]   ;;  %s4220_s4 = smov 8  }
   0x7   :  { %s4303_s29 = sld [smem:[%s4926_s0 + %s4218_s26]]   ;;  %s4221_s10 = smov 9  }
   0x8   :  { %s4308_s3 = sld [smem:[%s4926_s0 + %s4219_s30]]   ;;  %s4222_s15 = smov 10  }
   0x9   :  { %s4313_s8 = sld [smem:[%s4926_s0 + %s4220_s4]]   ;;  %s4223_s20 = smov 11  }
   0xa   :  { %s4318_s14 = sld [smem:[%s4926_s0 + %s4221_s10]]   ;;  %s4224_s26 = smov 12  }
   0xb   :  { %4944 = sst [smem:[#allocation7_spill]] %s4293_s21  ;;  %s4225_s1 = smov 13  }
   0xc   :  { %4945 = sst [smem:[#allocation8_spill]] %s4298_s25  ;;  %s4226_s7 = smov 14  }
   0xd   :  { %4946 = sst [smem:[#allocation9_spill]] %s4303_s29  ;;  %s4228_s22 = smov 16  }
   0xe   :  { %s4323_s19 = sld [smem:[%s4926_s0 + %s4222_s15]]   ;;  %s4227_s15 = smov 15  }
   0xf   :  { %s4328_s24 = sld [smem:[%s4926_s0 + %s4223_s20]]   ;;  %s4229_s28 = smov 17  }
  0x10   :  { %s4333_s30 = sld [smem:[%s4926_s0 + %s4224_s26]]   ;;  %s4259_s16 = smov 47  }
  0x11   :  { %s4338_s6 = sld [smem:[%s4926_s0 + %s4225_s1]]   ;;  %s4260_s23 = smov 48  }
  0x12   :  { %s4343_s12 = sld [smem:[%s4926_s0 + %s4226_s7]]   ;;  %s4230_s7 = smov 18  }
  0x13   :  { %s4348_s20 = sld [smem:[%s4926_s0 + %s4227_s15]]   ;;  %s4231_s15 = smov 19  }
  0x14   :  { %s4353_s27 = sld [smem:[%s4926_s0 + %s4228_s22]]   ;;  %s4232_s22 = smov 20  }
  0x15   :  { %s4358_s4 = sld [smem:[%s4926_s0 + %s4229_s28]]   ;;  %s4233_s28 = smov 21  }
  0x16   :  { %s4363_s29 = sld [smem:[%s4926_s0 + %s4230_s7]]   ;;  %s4234_s7 = smov 22  }
  0x17   :  { %s4368_s25 = sld [smem:[%s4926_s0 + %s4231_s15]]   ;;  %s4235_s15 = smov 23  }
  0x18   :  { %4947 = sst [smem:[#allocation10_spill]] %s4343_s12 }
  0x19   :  { %s4373_s21 = sld [smem:[%s4926_s0 + %s4232_s22]]   ;;  %s4236_s22 = smov 24  }
  0x1a   :  { %s4378_s12 = sld [smem:[%s4926_s0 + %s4233_s28]]   ;;  %s4237_s28 = smov 25  }
  0x1c   :  { %4948 = sst [smem:[#allocation11_spill]] %s4363_s29 }
  0x1d   :  { %4949 = sst [smem:[#allocation12_spill]] %s4368_s25 }
  0x1e   :  { %s4383_s29 = sld [smem:[%s4926_s0 + %s4234_s7]]   ;;  %s4238_s7 = smov 26  }
  0x1f   :  { %4950 = sst [smem:[#allocation13_spill]] %s4373_s21 }
  0x20   :  { %4951 = sst [smem:[#allocation14_spill]] %s4378_s12 }
  0x21   :  { %s4388_s25 = sld [smem:[%s4926_s0 + %s4235_s15]]   ;;  %s4239_s15 = smov 27  }
  0x22   :  { %s4393_s21 = sld [smem:[%s4926_s0 + %s4236_s22]]   ;;  %s4240_s22 = smov 28  }
  0x23   :  { %s4398_s12 = sld [smem:[%s4926_s0 + %s4237_s28]]   ;;  %s4241_s28 = smov 29  }
  0x24   :  { %4952 = sst [smem:[#allocation15_spill]] %s4383_s29 }
  0x25   :  { %s4403_s29 = sld [smem:[%s4926_s0 + %s4238_s7]]   ;;  %s4242_s7 = smov 30  }
  0x27   :  { %4953 = sst [smem:[#allocation16_spill]] %s4388_s25 }
  0x28   :  { %4954 = sst [smem:[#allocation17_spill]] %s4393_s21 }
  0x29   :  { %4955 = sst [smem:[#allocation18_spill]] %s4398_s12 }
  0x2a   :  { %s4408_s25 = sld [smem:[%s4926_s0 + %s4239_s15]]   ;;  %s4243_s15 = smov 31  }
  0x2b   :  { %4956 = sst [smem:[#allocation19_spill]] %s4403_s29 }
  0x2c   :  { %s4413_s21 = sld [smem:[%s4926_s0 + %s4240_s22]]   ;;  %s4244_s22 = smov 32  }
  0x2d   :  { %s4418_s12 = sld [smem:[%s4926_s0 + %s4241_s28]]   ;;  %s4245_s28 = smov 33  }
  0x2e   :  { %s4423_s29 = sld [smem:[%s4926_s0 + %s4242_s7]]   ;;  %s4246_s7 = smov 34  }
  0x30   :  { %4957 = sst [smem:[#allocation20_spill]] %s4408_s25 }
  0x31   :  { %s4428_s25 = sld [smem:[%s4926_s0 + %s4243_s15]]   ;;  %s4247_s15 = smov 35  }
  0x32   :  { %4958 = sst [smem:[#allocation21_spill]] %s4413_s21 }
  0x33   :  { %4959 = sst [smem:[#allocation22_spill]] %s4418_s12 }
  0x34   :  { %4960 = sst [smem:[#allocation23_spill]] %s4423_s29 }
  0x35   :  { %s4433_s21 = sld [smem:[%s4926_s0 + %s4244_s22]]   ;;  %s4248_s22 = smov 36  }
  0x36   :  { %s4438_s12 = sld [smem:[%s4926_s0 + %s4245_s28]]   ;;  %s4249_s28 = smov 37  }
  0x37   :  { %4961 = sst [smem:[#allocation24_spill]] %s4428_s25 }
  0x38   :  { %s4443_s29 = sld [smem:[%s4926_s0 + %s4246_s7]]   ;;  %s4250_s7 = smov 38  }
  0x39   :  { %s4448_s25 = sld [smem:[%s4926_s0 + %s4247_s15]]   ;;  %s4251_s15 = smov 39  }
  0x3b   :  { %4962 = sst [smem:[#allocation25_spill]] %s4433_s21 }
  0x3c   :  { %4963 = sst [smem:[#allocation26_spill]] %s4438_s12 }
  0x3d   :  { %s4453_s21 = sld [smem:[%s4926_s0 + %s4248_s22]]   ;;  %s4252_s22 = smov 40  }
  0x3e   :  { %4964 = sst [smem:[#allocation27_spill]] %s4443_s29 }
  0x3f   :  { %4965 = sst [smem:[#allocation28_spill]] %s4448_s25 }
  0x40   :  { %s4458_s12 = sld [smem:[%s4926_s0 + %s4249_s28]]   ;;  %s4253_s28 = smov 41  }
  0x41   :  { %s4463_s29 = sld [smem:[%s4926_s0 + %s4250_s7]]   ;;  %s4254_s7 = smov 42  }
  0x42   :  { %s4468_s25 = sld [smem:[%s4926_s0 + %s4251_s15]]   ;;  %s4255_s15 = smov 43  }
  0x43   :  { %4966 = sst [smem:[#allocation29_spill]] %s4453_s21 }
  0x44   :  { %s4473_s21 = sld [smem:[%s4926_s0 + %s4252_s22]]   ;;  %s4256_s22 = smov 44  }
  0x46   :  { %4967 = sst [smem:[#allocation30_spill]] %s4458_s12 }
  0x47   :  { %4968 = sst [smem:[#allocation31_spill]] %s4463_s29 }
  0x48   :  { %4969 = sst [smem:[#allocation32_spill]] %s4468_s25 }
  0x49   :  { %s4478_s12 = sld [smem:[%s4926_s0 + %s4253_s28]]   ;;  %s4257_s28 = smov 45  }
  0x4a   :  { %4970 = sst [smem:[#allocation33_spill]] %s4473_s21 }
  0x4b   :  { %s4483_s29 = sld [smem:[%s4926_s0 + %s4254_s7]]   ;;  %s4258_s7 = smov 46  }
  0x4c   :  { %s4488_s25 = sld [smem:[%s4926_s0 + %s4255_s15]]  }
  0x4d   :  { %s4493_s21 = sld [smem:[%s4926_s0 + %s4256_s22]]  }
  0x4f   :  { %4971 = sst [smem:[#allocation34_spill]] %s4478_s12 }
  0x50   :  { %s4498_s12 = sld [smem:[%s4926_s0 + %s4257_s28]]  }
  0x51   :  { %4972 = sst [smem:[#allocation35_spill]] %s4483_s29 }
  0x52   :  { %4973 = sst [smem:[#allocation36_spill]] %s4488_s25 }
  0x53   :  { %4974 = sst [smem:[#allocation37_spill]] %s4493_s21 }
  0x54   :  { %s3402_s29 = sld [smem:[%s4926_s0 + %s4258_s7]]  }
  0x55   :  { %s4506_s25 = sld [smem:[%s4926_s0 + %s4259_s16]]  }
  0x56   :  { %s4511_s21 = sld [smem:[%s4926_s0 + %s4260_s23]]  }
  0x5a   :  { %v104_v0 = vstv %s3402_s29 }
  0x5b   :  { %105 = vst [vmem:[#allocation3] sm:$0x1] %v104_v0 }
  0x5c   :  { %v219_v1 = vld [vmem:[%s4308_s3] sm:$0xf]  ;;  %vm234_vm0 = vcmask 1043456   ;;  %vm227_vm1 = vcmask 31744   ;;  %v218_v3 = vld [vmem:[%s4273_s5 + $0x8] sm:$0xff]  ;;  %vm445_vm2 = vcmask 1042432  }
  0x5d   :  { %v217_v2 = vld [vmem:[%s4273_s5] sm:$0xff]  ;;  %3749 = vmatprep.subr.msk.mxu0 %vm234_vm0, %v219_v1  ;;  %vm426_vm3 = vcmask 23552  }
  0x5e   :  { %3751 = vmatprep.mubr.msk.f32.mxu0 %vm227_vm1, %v217_v2  ;;  %v418_v4 = vld [vmem:[%s4328_s24] sm:$0x7]  ;;  %3750 = vmatpush3.msk.msra.mxu0 %vm234_vm0, %v219_v1 }
  0x5f   :  { %v412_v5 = vld [vmem:[%s4278_s9] sm:$0xff] }
  0x60   :  { %106 = vsyncpa [#allocation5], 0  ;;  %3752 = vmatmul.mubr.msk.f32.vlgmr.msra.gmra.mxu0 %vm227_vm1, %v218_v3  ;;  %3765 = vmatprep.subr.msk.mxu0 %vm445_vm2, %v418_v4  ;;  %v413_v6 = vld [vmem:[%s4278_s9 + $0x8] sm:$0xff]  ;;  %v414_v7 = vld [vmem:[%s4278_s9 + $0x10] sm:$0xff]  ;;  %vm330_vm6 = vcmask 261120   ;;  %vm686_vm13 = vcmask 130048  }
  0x61   :  { %3766 = vmatpush3.msk.msra.mxu0 %vm445_vm2, %v418_v4  ;;  %3767 = vmatprep.mubr.msk.f32.mxu0 %vm426_vm3, %v412_v5  ;;  %v415_v8 = vld [vmem:[%s4278_s9 + $0x18] sm:$0xff]  ;;  %v416_v9 = vld [vmem:[%s4278_s9 + $0x20] sm:$0xff]  ;;  %v417_v10 = vld [vmem:[%s4278_s9 + $0x28] sm:$0xff]  ;;  %s4975_s0 = sld [smem:[#allocation10_spill]] }
  0x62   :  { %v322_v11 = vld [vmem:[%s4318_s14 + $0x18] sm:$0xff]  ;;  %v321_v12 = vld [vmem:[%s4318_s14 + $0x10] sm:$0xff]  ;;  %v320_v13 = vld [vmem:[%s4318_s14 + $0x8] sm:$0xff]  ;;  %s4976_s5 = sld [smem:[#allocation12_spill]] }
  0x63   :  { %3754 = vmatprep.subr.mxu1 %v322_v11  ;;  %v319_v14 = vld [vmem:[%s4318_s14] sm:$0xff]  ;;  %v565_v15 = vld [vmem:[%s4338_s6 + $0x18] sm:$0xff]  ;;  %v564_v30 = vld [vmem:[%s4338_s6 + $0x10] sm:$0xff]  ;;  %s4977_s9 = sld [smem:[#allocation14_spill]] }
  0x64   :  { %3768 = vmatmul.mubr.msk.f32.vlgmr.msra.gmra.mxu0 %vm426_vm3, %v413_v6  ;;  %3755 = vmatpush3.msra.mxu1 %v322_v11  ;;  %v3405_v16 = vld [vmem:[%s4313_s8] ss:$0 sm:$0xff]  ;;  %v563_v35 = vld [vmem:[%s4338_s6 + $0x8] sm:$0xff]  ;;  %v4575_v62 = vld [vmem:[%s4288_s17 + $0x10] sm:$0xff]  ;;  %s4980_s29 = sld [smem:[#allocation8_spill]] }
  0x65   :  { %3770 = vmatprep.mubr.msk.f32.mxu0 %vm426_vm3, %v414_v7  ;;  %3756 = vmatprep.subr.mxu1 %v321_v12  ;;  %v3412_v21 = vld [vmem:[%s4333_s30] ss:$0 sm:$0xff]  ;;  %v4567_v60 = vld [vmem:[%s4288_s17 + $0x8] sm:$0xff]  ;;  %v4578_v63 = vld [vmem:[%s4283_s13 + $0x10] sm:$0xff]  ;;  %s4981_s3 = sld [smem:[#allocation13_spill]] }
  0x66   :  { %3757 = vmatpush3.msra.mxu1 %v321_v12  ;;  %v562_v39 = vld [vmem:[%s4338_s6] sm:$0xff]  ;;  %v4570_v61 = vld [vmem:[%s4283_s13 + $0x8] sm:$0xff]  ;;  %v920_v0 = vld [vmem:[%s4353_s27 + $0x18] sm:$0xff]  ;;  %s4982_s8 = sld [smem:[#allocation15_spill]] }
  0x67   :  { %3758 = vmatprep.subr.mxu1 %v320_v13  ;;  %v4548_v53 = vld [vmem:[%s4288_s17] sm:$0xff]  ;;  %v916_v1 = vld [vmem:[%s4348_s20 + $0x18] sm:$0xff]  ;;  %v919_v6 = vld [vmem:[%s4353_s27 + $0x10] sm:$0xff]  ;;  %s4983_s14 = sld [smem:[#allocation17_spill]] }
  0x68   :  { %3771 = vmatmul.mubr.msk.f32.gmra.mxu0 %vm426_vm3, %v415_v8  ;;  %3759 = vmatpush3.msra.mxu1 %v320_v13  ;;  %v4551_v54 = vld [vmem:[%s4283_s13] sm:$0xff]  ;;  %v4591_v2 = vld [vmem:[%s4288_s17 + $0x18] sm:$0xff]  ;;  %v4612_v7 = vld [vmem:[%s4288_s17 + $0x28] sm:$0xff]  ;;  %s4985_s24 = sld [smem:[#allocation18_spill]] }
  0x69   :  { %3773 = vmatprep.mubr.msk.f32.mxu0 %vm426_vm3, %v416_v9  ;;  %3760 = vmatprep.subr.mxu1 %v319_v14  ;;  %v3409_v55 = vld [vmem:[%s4323_s19] ss:$0 sm:$0xff]  ;;  %v4596_v3 = vld [vmem:[%s4283_s13 + $0x18] sm:$0xff]  ;;  %v4617_v8 = vld [vmem:[%s4283_s13 + $0x28] sm:$0xff]  ;;  %s4984_s19 = sld [smem:[#allocation16_spill]] }
  0x6a   :  { %3761 = vmatpush3.msra.mxu1 %v319_v14  ;;  %v4599_v4 = vld [vmem:[%s4288_s17 + $0x20] sm:$0xff]  ;;  %v915_v9 = vld [vmem:[%s4348_s20 + $0x10] sm:$0xff]  ;;  %v914_v11 = vld [vmem:[%s4348_s20 + $0x8] sm:$0xff]  ;;  %s4979_s17 = sld [smem:[#allocation7_spill]] }
  0x6b   :  { %3776 = vmatprep.subr.mxu1 %v565_v15  ;;  %v4602_v5 = vld [vmem:[%s4283_s13 + $0x20] sm:$0xff]  ;;  %v1150_v14 = vld [vmem:[%s4358_s4 + $0x18] sm:$0xff]  ;;  %s4978_s13 = sld [smem:[#allocation11_spill]] }
  0x6c   :  { %3774 = vmatmul.mubr.msk.f32.gmra.mxu0 %vm426_vm3, %v417_v10  ;;  %v918_v10 = vld [vmem:[%s4353_s27 + $0x8] sm:$0xff]  ;;  %v917_v12 = vld [vmem:[%s4353_s27] sm:$0xff]  ;;  %s4986_s30 = sld [smem:[#allocation20_spill]] }
  0x6d   :  { %3797 = vmatprep.mubr.msk.f32.mxu0 %vm686_vm13, %v4551_v54  ;;  %v913_v13 = vld [vmem:[%s4348_s20] sm:$0xff]  ;;  %s4987_s6 = sld [smem:[#allocation19_spill]] }
  0x6e   :  { %s4988_s20 = sld [smem:[#allocation21_spill]] }
  0x6f   :  { %s4989_s27 = sld [smem:[#allocation23_spill]] }
  0x70   :  { %s4991_s28 = sld [smem:[#allocation26_spill]] }
  0x71   :  { %s4992_s1 = sld [smem:[#allocation24_spill]] }
  0x72   :  { %s4993_s2 = sld [smem:[#allocation25_spill]] }
  0x73   :  { %s4994_s7 = sld [smem:[#allocation28_spill]] }
  0x74   :  { %s4995_s10 = sld [smem:[#allocation27_spill]] }
  0x75   :  { %s4996_s11 = sld [smem:[#allocation30_spill]] }
  0x76   :  { %s4997_s16 = sld [smem:[#allocation29_spill]] }
  0x77   :  { %s4998_s15 = sld [smem:[#allocation9_spill]] }
  0x78   :  { %s4999_s18 = sld [smem:[#allocation34_spill]] }
  0x79   :  { %s5000_s23 = sld [smem:[#allocation32_spill]] }
  0x7a   :  { %s5001_s22 = sld [smem:[#allocation31_spill]] }
  0x7b   :  { %s5002_s26 = sld [smem:[#allocation36_spill]] }
 0x120   :  { %v3753_v17 = vpop.f32.mrf.mxu0 }
 0x121   :  { %v310_v18 = vadd.f32 %v3753_v17, %v3405_v16 }
 0x122   :  { %v304_v19 = vpop.f32.mrf.mxu0 }
 0x123   :  { %v305_v20 = vadd.f32 %v3405_v16, %v304_v19  ;;  %v316_v22 = vmul.f32 0.01, %v310_v18  ;;  %vm314_vm4 = vcmp.gt.f32.partialorder %v310_v18, 0.0 }
 0x124   :  { %v3769_v23 = vpop.f32.mrf.mxu0 }
 0x125   :  { %vm313_vm5 = vcmp.gt.f32.partialorder %v305_v20, 0.0  ;;  %v315_v24 = vmul.f32 0.01, %v305_v20  ;;  %v521_v25 = vadd.f32 %v3769_v23, %v3412_v21  ;;  %v318_v29 = vsel %vm314_vm4, %v310_v18, %v316_v22 }
 0x126   :  { %v515_v26 = vpop.f32.mrf.mxu0  ;;  %vm1425_vm4 = vcmask 392192  }
 0x127   :  { %v317_v27 = vsel %vm313_vm5, %v305_v20, %v315_v24  ;;  %v516_v28 = vadd.f32 %v3412_v21, %v515_v26  ;;  %v551_v33 = vmul.f32 0.01, %v521_v25  ;;  %vm545_vm8 = vcmp.gt.f32.partialorder %v521_v25, 0.0 }
 0x128   :  { %3762 = vmatprep.mubr.msk.f32.mxu1 %vm330_vm6, %v317_v27  ;;  %v3772_v31 = vpop.f32.mrf.mxu0 }
 0x129   :  { %3763 = vmatmul.mubr.msk.f32.vlgmr.msra.gmra.mxu1 %vm330_vm6, %v318_v29  ;;  %vm544_vm7 = vcmp.gt.f32.partialorder %v516_v28, 0.0  ;;  %v550_v32 = vmul.f32 0.01, %v516_v28  ;;  %v531_v34 = vadd.f32 %v3772_v31, %v3412_v21  ;;  %v557_v41 = vsel %vm545_vm8, %v521_v25, %v551_v33  ;;  %v1149_v25 = vld [vmem:[%s4358_s4 + $0x10] sm:$0xff]  ;;  %v3420_v31 = vld [vmem:[%s4975_s0] ss:$0 sm:$0xff] }
 0x12a   :  { %3777 = vmatpush3.msra.mxu1 %v565_v15  ;;  %v525_v36 = vpop.f32.mrf.mxu0  ;;  %s5003_s0 = sld [smem:[#allocation35_spill]] }
 0x12b   :  { %3778 = vmatprep.subr.mxu1 %v564_v30  ;;  %v526_v37 = vadd.f32 %v3412_v21, %v525_v36  ;;  %v556_v38 = vsel %vm544_vm7, %v516_v28, %v550_v32  ;;  %v553_v42 = vmul.f32 0.01, %v531_v34  ;;  %vm547_vm10 = vcmp.gt.f32.partialorder %v531_v34, 0.0  ;;  %v1147_v36 = vld [vmem:[%s4358_s4] sm:$0xff] }
 0x12c   :  { %3779 = vmatpush3.msra.mxu1 %v564_v30  ;;  %3784 = vmatprep.mubr.msk.f32.mxu1 %vm330_vm6, %v556_v38  ;;  %v3775_v45 = vpop.f32.mrf.mxu0  ;;  %v1148_v30 = vld [vmem:[%s4358_s4 + $0x8] sm:$0xff]  ;;  %s4990_s4 = sld [smem:[#allocation22_spill]] }
 0x12d   :  { %3780 = vmatprep.subr.mxu1 %v563_v35  ;;  %vm546_vm9 = vcmp.gt.f32.partialorder %v526_v37, 0.0  ;;  %v552_v40 = vmul.f32 0.01, %v526_v37  ;;  %v559_v44 = vsel %vm547_vm10, %v531_v34, %v553_v42  ;;  %v541_v46 = vadd.f32 %v3775_v45, %v3412_v21  ;;  %v1302_v45 = vld [vmem:[%s4976_s5 + $0x8] sm:$0xff] }
 0x12e   :  { %3781 = vmatpush3.msra.mxu1 %v563_v35  ;;  %v535_v47 = vpop.f32.mrf.mxu0 }
 0x12f   :  { %3782 = vmatprep.subr.mxu1 %v562_v39  ;;  %v558_v43 = vsel %vm546_vm9, %v526_v37, %v552_v40  ;;  %v536_v48 = vadd.f32 %v3412_v21, %v535_v47  ;;  %v555_v49 = vmul.f32 0.01, %v541_v46  ;;  %vm549_vm11 = vcmp.gt.f32.partialorder %v541_v46, 0.0  ;;  %v1522_v47 = vld [vmem:[%s4977_s9 + $0x18] sm:$0xff] }
 0x130   :  { %3783 = vmatpush3.msra.mxu1 %v562_v39 }
 0x131   :  { %3785 = vmatmul.mubr.msk.f32.vlgmr.msra.gmra.mxu1 %vm330_vm6, %v557_v41  ;;  %vm548_vm12 = vcmp.gt.f32.partialorder %v536_v48, 0.0  ;;  %v554_v50 = vmul.f32 0.01, %v536_v48  ;;  %v561_v52 = vsel %vm549_vm11, %v541_v46, %v555_v49  ;;  %v1301_v46 = vld [vmem:[%s4976_s5] sm:$0xff] }
 0x132   :  { %3787 = vmatprep.mubr.msk.f32.mxu1 %vm330_vm6, %v558_v43  ;;  %v1304_v43 = vld [vmem:[%s4976_s5 + $0x18] sm:$0xff] }
 0x133   :  { %v560_v51 = vsel %vm548_vm12, %v536_v48, %v554_v50 }
 0x135   :  { %3788 = vmatmul.mubr.msk.f32.gmra.mxu1 %vm330_vm6, %v559_v44  ;;  %v1303_v44 = vld [vmem:[%s4976_s5 + $0x10] sm:$0xff]  ;;  %s5004_s5 = sld [smem:[#allocation33_spill]] }
 0x136   :  { %3790 = vmatprep.mubr.msk.f32.mxu1 %vm330_vm6, %v560_v51 }
 0x139   :  { %3791 = vmatmul.mubr.msk.f32.gmra.mxu1 %vm330_vm6, %v561_v52 }
 0x13a   :  { %3810 = vmatprep.mubr.msk.f32.mxu1 %vm686_vm13, %v4548_v53 }
 0x1e9   :  { %v3764_v56 = vpop.f32.mrf.mxu1 }
 0x1ea   :  { %v4558_v57 = vadd.f32 %v3764_v56, %v3409_v55 }
 0x1eb   :  { %v403_v58 = vpop.f32.mrf.mxu1 }
 0x1ec   :  { %v4560_v59 = vadd.f32 %v3409_v55, %v403_v58  ;;  %3793 = vmatprep.subr.mxu0 %v4558_v57  ;;  %3806 = vmatprep.subr.mxu1 %v4558_v57 }
 0x1ed   :  { %3794 = vmatpush3.msra.mxu0 %v4558_v57  ;;  %3807 = vmatpush3.msra.mxu1 %v4558_v57 }
 0x1ee   :  { %3795 = vmatprep.subr.mxu0 %v4560_v59  ;;  %3808 = vmatprep.subr.mxu1 %v4560_v59 }
 0x1ef   :  { %3796 = vmatpush3.msra.mxu0 %v4560_v59  ;;  %3809 = vmatpush3.msra.mxu1 %v4560_v59 }
 0x1f0   :  { %3811 = vmatmul.mubr.msk.f32.vlgmr.msra.gmra.mxu1 %vm686_vm13, %v4567_v60  ;;  %3798 = vmatmul.mubr.msk.f32.vlgmr.msra.gmra.mxu0 %vm686_vm13, %v4570_v61 }
 0x1f1   :  { %3813 = vmatprep.mubr.msk.f32.mxu1 %vm686_vm13, %v4575_v62  ;;  %3800 = vmatprep.mubr.msk.f32.mxu0 %vm686_vm13, %v4578_v63  ;;  %v3786_v15 = vpop.f32.mrf.mxu1 }
 0x1f2   :  { %3819 = vmatprep.subr.mxu0 %v920_v0  ;;  %3836 = vmatprep.subr.mxu1 %v916_v1  ;;  %v4648_v38 = vadd.f32 %v3786_v15, %v3420_v31 }
 0x1f3   :  { %3820 = vmatpush3.msra.mxu0 %v920_v0  ;;  %3837 = vmatpush3.msra.mxu1 %v916_v1  ;;  %v657_v16 = vpop.f32.mrf.mxu1 }
 0x1f4   :  { %3814 = vmatmul.mubr.msk.f32.gmra.mxu1 %vm686_vm13, %v4591_v2  ;;  %3801 = vmatmul.mubr.msk.f32.gmra.mxu0 %vm686_vm13, %v4596_v3  ;;  %v4641_v37 = vadd.f32 %v3420_v31, %v657_v16 }
 0x1f5   :  { %3816 = vmatprep.mubr.msk.f32.mxu1 %vm686_vm13, %v4599_v4  ;;  %3803 = vmatprep.mubr.msk.f32.mxu0 %vm686_vm13, %v4602_v5  ;;  %v3789_v17 = vpop.f32.mrf.mxu1 }
 0x1f6   :  { %3821 = vmatprep.subr.mxu0 %v919_v6  ;;  %3838 = vmatprep.subr.mxu1 %v915_v9  ;;  %v4657_v40 = vadd.f32 %v3789_v17, %v3420_v31 }
 0x1f7   :  { %3822 = vmatpush3.msra.mxu0 %v919_v6  ;;  %3839 = vmatpush3.msra.mxu1 %v915_v9  ;;  %v667_v18 = vpop.f32.mrf.mxu1 }
 0x1f8   :  { %3817 = vmatmul.mubr.msk.f32.gmra.mxu1 %vm686_vm13, %v4612_v7  ;;  %3804 = vmatmul.mubr.msk.f32.gmra.mxu0 %vm686_vm13, %v4617_v8  ;;  %v4651_v39 = vadd.f32 %v3420_v31, %v667_v18 }
 0x1f9   :  { %3823 = vmatprep.subr.mxu0 %v918_v10  ;;  %3840 = vmatprep.subr.mxu1 %v914_v11  ;;  %v3792_v19 = vpop.f32.mrf.mxu1 }
 0x1fa   :  { %3824 = vmatpush3.msra.mxu0 %v918_v10  ;;  %3841 = vmatpush3.msra.mxu1 %v914_v11  ;;  %v4665_v42 = vadd.f32 %v3792_v19, %v3420_v31  ;;  %v3457_v10 = vld [vmem:[%s4978_s13] ss:$0 sm:$0xff] }
 0x1fb   :  { %3825 = vmatprep.subr.mxu0 %v917_v12  ;;  %3842 = vmatprep.subr.mxu1 %v913_v13  ;;  %v677_v20 = vpop.f32.mrf.mxu1 }
 0x1fc   :  { %3826 = vmatpush3.msra.mxu0 %v917_v12  ;;  %3843 = vmatpush3.msra.mxu1 %v913_v13  ;;  %v4659_v41 = vadd.f32 %v3420_v31, %v677_v20 }
 0x1fd   :  { %3853 = vmatprep.subr.mxu0 %v1150_v14  ;;  %3870 = vmatprep.subr.mxu1 %v1304_v43 }
 0x2b0   :  { %v3812_v21 = vpop.f32.mrf.mxu1  ;;  %v3799_v22 = vpop.f32.mrf.mxu0 }
 0x2b2   :  { %v884_v23 = vpop.f32.mrf.mxu1  ;;  %v771_v24 = vpop.f32.mrf.mxu0 }
 0x2b3   :  { %3827 = vmatprep.mubr.msk.f32.mxu0 %vm330_vm6, %v884_v23  ;;  %3844 = vmatprep.mubr.msk.f32.mxu1 %vm330_vm6, %v771_v24 }
 0x2b4   :  { %v3815_v26 = vpop.f32.mrf.mxu1  ;;  %3828 = vmatmul.mubr.msk.f32.vlgmr.msra.gmra.mxu0 %vm330_vm6, %v3812_v21  ;;  %v3802_v27 = vpop.f32.mrf.mxu0  ;;  %3845 = vmatmul.mubr.msk.f32.vlgmr.msra.gmra.mxu1 %vm330_vm6, %v3799_v22 }
 0x2b5   :  { %3854 = vmatpush3.msra.mxu0 %v1150_v14  ;;  %3871 = vmatpush3.msra.mxu1 %v1304_v43  ;;  %v1521_v43 = vld [vmem:[%s4977_s9 + $0x10] sm:$0xff] }
 0x2b6   :  { %v894_v28 = vpop.f32.mrf.mxu1  ;;  %v781_v29 = vpop.f32.mrf.mxu0  ;;  %3855 = vmatprep.subr.mxu0 %v1149_v25  ;;  %3872 = vmatprep.subr.mxu1 %v1303_v44 }
 0x2b7   :  { %3830 = vmatprep.mubr.msk.f32.mxu0 %vm330_vm6, %v894_v28  ;;  %3847 = vmatprep.mubr.msk.f32.mxu1 %vm330_vm6, %v781_v29 }
 0x2b8   :  { %v3818_v32 = vpop.f32.mrf.mxu1  ;;  %3831 = vmatmul.mubr.msk.f32.gmra.mxu0 %vm330_vm6, %v3815_v26  ;;  %v3805_v33 = vpop.f32.mrf.mxu0  ;;  %3848 = vmatmul.mubr.msk.f32.gmra.mxu1 %vm330_vm6, %v3802_v27 }
 0x2b9   :  { %3856 = vmatpush3.msra.mxu0 %v1149_v25  ;;  %3873 = vmatpush3.msra.mxu1 %v1303_v44 }
 0x2ba   :  { %v904_v34 = vpop.f32.mrf.mxu1  ;;  %3857 = vmatprep.subr.mxu0 %v1148_v30  ;;  %v791_v35 = vpop.f32.mrf.mxu0  ;;  %3874 = vmatprep.subr.mxu1 %v1302_v45 }
 0x2bb   :  { %3833 = vmatprep.mubr.msk.f32.mxu0 %vm330_vm6, %v904_v34  ;;  %3858 = vmatpush3.msra.mxu0 %v1148_v30 }
 0x2bc   :  { %3834 = vmatmul.mubr.msk.f32.gmra.mxu0 %vm330_vm6, %v3818_v32  ;;  %3850 = vmatprep.mubr.msk.f32.mxu1 %vm330_vm6, %v791_v35 }
 0x2bd   :  { %3861 = vmatprep.mubr.msk.f32.mxu0 %vm330_vm6, %v4641_v37  ;;  %3859 = vmatprep.subr.mxu0 %v1147_v36 }
 0x2be   :  { %3851 = vmatmul.mubr.msk.f32.gmra.mxu1 %vm330_vm6, %v3805_v33  ;;  %3860 = vmatpush3.msra.mxu0 %v1147_v36 }
 0x2bf   :  { %3875 = vmatpush3.msra.mxu1 %v1302_v45 }
 0x2c0   :  { %3862 = vmatmul.mubr.msk.f32.vlgmr.msra.gmra.mxu0 %vm330_vm6, %v4648_v38  ;;  %3876 = vmatprep.subr.mxu1 %v1301_v46 }
 0x2c1   :  { %3864 = vmatprep.mubr.msk.f32.mxu0 %vm330_vm6, %v4651_v39  ;;  %3877 = vmatpush3.msra.mxu1 %v1301_v46 }
 0x2c2   :  { %3913 = vmatprep.subr.mxu1 %v1522_v47 }
 0x2c4   :  { %3865 = vmatmul.mubr.msk.f32.gmra.mxu0 %vm330_vm6, %v4657_v40 }
 0x2c5   :  { %3867 = vmatprep.mubr.msk.f32.mxu0 %vm330_vm6, %v4659_v41 }
 0x2c8   :  { %3868 = vmatmul.mubr.msk.f32.gmra.mxu0 %vm330_vm6, %v4665_v42 }
 0x374   :  { %v3829_v48 = vpop.f32.mrf.mxu0  ;;  %v3846_v49 = vpop.f32.mrf.mxu1 }
 0x375   :  { %v1124_v6 = vadd.f32 %v3846_v49, %v3829_v48  ;;  %v1520_v48 = vld [vmem:[%s4977_s9 + $0x8] sm:$0xff] }
 0x376   :  { %v1005_v50 = vpop.f32.mrf.mxu0  ;;  %v1118_v51 = vpop.f32.mrf.mxu1 }
 0x377   :  { %v1119_v11 = vadd.f32 %v1118_v51, %v1005_v50 }
 0x378   :  { %v3832_v52 = vpop.f32.mrf.mxu0  ;;  %v3849_v56 = vpop.f32.mrf.mxu1 }
 0x379   :  { %v1134_v15 = vadd.f32 %v3849_v56, %v3832_v52 }
 0x37a   :  { %v1015_v55 = vpop.f32.mrf.mxu0  ;;  %v1128_v0 = vpop.f32.mrf.mxu1 }
 0x37b   :  { %v1129_v19 = vadd.f32 %v1128_v0, %v1015_v55  ;;  %v1519_v55 = vld [vmem:[%s4977_s9] sm:$0xff]  ;;  %s5005_s9 = sld [smem:[#allocation37_spill]] }
 0x37c   :  { %v3835_v58 = vpop.f32.mrf.mxu0  ;;  %v4691_v0 = vld [vmem:[%s4979_s17] sm:$0xff] }
 0x37d   :  { %3899 = vmatprep.mubr.msk.f32.mxu0 %vm1425_vm4, %v4691_v0 }
 0x37e   :  { %v1025_v1 = vpop.f32.mrf.mxu0  ;;  %v3852_v13 = vpop.f32.mrf.mxu1 }
 0x37f   :  { %v1144_v22 = vadd.f32 %v3852_v13, %v3835_v58 }
 0x380   :  { %v3863_v9 = vpop.f32.mrf.mxu0  ;;  %v1138_v24 = vpop.f32.mrf.mxu1 }
 0x381   :  { %v1265_v12 = vadd.f32 %v3863_v9, %v1124_v6  ;;  %v1139_v30 = vadd.f32 %v1138_v24, %v1025_v1  ;;  %v215_v1 = vld [vmem:[%s4980_s29] sm:$0xff]  ;;  %v4261_v6 = vmov 0   ;;  %v216_v9 = vld [vmem:[%s4980_s29 + $0x8] sm:$0xff]  ;;  %v1525_v24 = vld [vmem:[%s4982_s8 + $0x10] sm:$0xff] }
 0x382   :  { %v1235_v14 = vpop.f32.mrf.mxu0  ;;  %4184 = vset.pattern.permute.xlu0 %v4261_v6 }
 0x383   :  { %v1278_v16 = vadd.f32 %v3457_v10, %v1265_v12  ;;  %v1264_v17 = vadd.f32 %v1235_v14, %v1119_v11  ;;  %1509 = vperm.xlu0 %4184, %v215_v1   ;;  %v3458_v14 = vld [vmem:[%s4981_s3] ss:$0 sm:$0xff] }
 0x384   :  { %v3866_v18 = vpop.f32.mrf.mxu0  ;;  %v3472_v1 = vld [vmem:[%s4985_s24] ss:$0 sm:$0xff] }
 0x385   :  { %v1277_v20 = vadd.f32 %v3457_v10, %v1264_v17  ;;  %v1267_v21 = vadd.f32 %v3866_v18, %v1134_v15  ;;  %v1290_v23 = vmul.f32 0.01, %v1278_v16  ;;  %vm1284_vm14 = vcmp.gt.f32.partialorder %v1278_v16, 0.0 }
 0x386   :  { %v1245_v25 = vpop.f32.mrf.mxu0 }
 0x387   :  { %v1289_v26 = vmul.f32 0.01, %v1277_v20  ;;  %v1280_v27 = vadd.f32 %v3457_v10, %v1267_v21  ;;  %v1266_v28 = vadd.f32 %v1245_v25, %v1129_v19  ;;  %vm1283_vm15 = vcmp.gt.f32.partialorder %v1277_v20, 0.0  ;;  %1514 = vperm.xlu0 %4184, %v216_v9   ;;  %v1524_v25 = vld [vmem:[%s4982_s8 + $0x8] sm:$0xff] }
 0x388   :  { %v3869_v29 = vpop.f32.mrf.mxu0  ;;  %v1296_v34 = vsel %vm1284_vm14, %v1278_v16, %v1290_v23  ;;  %v1526_v23 = vld [vmem:[%s4982_s8 + $0x18] sm:$0xff] }
 0x389   :  { %v1279_v31 = vadd.f32 %v3457_v10, %v1266_v28  ;;  %v1269_v32 = vadd.f32 %v3869_v29, %v1144_v22  ;;  %v1295_v33 = vsel %vm1283_vm15, %v1277_v20, %v1289_v26  ;;  %v1292_v35 = vmul.f32 0.01, %v1280_v27  ;;  %v4721_v22 = vld [vmem:[%s4979_s17 + $0x8] sm:$0xff]  ;;  %v1523_v26 = vld [vmem:[%s4982_s8] sm:$0xff] }
 0x38a   :  { %v1255_v36 = vpop.f32.mrf.mxu0  ;;  %3878 = vmatprep.mubr.msk.f32.mxu1 %vm330_vm6, %v1295_v33  ;;  %vm1286_vm0 = vcmp.gt.f32.partialorder %v1280_v27, 0.0  ;;  %v1707_v33 = vld [vmem:[%s4983_s14 + $0x18] sm:$0xff] }
 0x38b   :  { %v1291_v44 = vmul.f32 0.01, %v1279_v31  ;;  %v1282_v45 = vadd.f32 %v3457_v10, %v1269_v32  ;;  %v1268_v46 = vadd.f32 %v1255_v36, %v1139_v30  ;;  %3879 = vmatmul.mubr.msk.f32.vlgmr.msra.gmra.mxu1 %vm330_vm6, %v1296_v34  ;;  %vm1285_vm1 = vcmp.gt.f32.partialorder %v1279_v31, 0.0  ;;  %v1706_v34 = vld [vmem:[%s4983_s14 + $0x10] sm:$0xff]  ;;  %v1704_v36 = vld [vmem:[%s4983_s14] sm:$0xff] }
 0x38c   :  { %3914 = vmatpush3.msra.mxu1 %v1522_v47  ;;  %v1298_v52 = vsel %vm1286_vm0, %v1280_v27, %v1292_v35  ;;  %v1705_v35 = vld [vmem:[%s4983_s14 + $0x8] sm:$0xff]  ;;  %vm4263_vm0 = vmmov 0  }
 0x38d   :  { %v1281_v49 = vadd.f32 %v3457_v10, %v1268_v46  ;;  %v1297_v50 = vsel %vm1285_vm1, %v1279_v31, %v1291_v44  ;;  %3915 = vmatprep.subr.mxu1 %v1521_v43  ;;  %v1294_v51 = vmul.f32 0.01, %v1282_v45  ;;  %vm1288_vm3 = vcmp.gt.f32.partialorder %v1282_v45, 0.0 }
 0x38e   :  { %3881 = vmatprep.mubr.msk.f32.mxu1 %vm330_vm6, %v1297_v50  ;;  %3916 = vmatpush3.msra.mxu1 %v1521_v43 }
 0x38f   :  { %v1293_v56 = vmul.f32 0.01, %v1281_v49  ;;  %3882 = vmatmul.mubr.msk.f32.gmra.mxu1 %vm330_vm6, %v1298_v52  ;;  %vm1287_vm2 = vcmp.gt.f32.partialorder %v1281_v49, 0.0  ;;  %3917 = vmatprep.subr.mxu1 %v1520_v48  ;;  %v1300_v58 = vsel %vm1288_vm3, %v1282_v45, %v1294_v51  ;;  %v3471_v45 = vld [vmem:[%s4984_s19] ss:$0 sm:$0xff] }
 0x390   :  { %3918 = vmatpush3.msra.mxu1 %v1520_v48 }
 0x391   :  { %v1299_v47 = vsel %vm1287_vm2, %v1281_v49, %v1293_v56  ;;  %3919 = vmatprep.subr.mxu1 %v1519_v55 }
 0x392   :  { %3884 = vmatprep.mubr.msk.f32.mxu1 %vm330_vm6, %v1299_v47  ;;  %3920 = vmatpush3.msra.mxu1 %v1519_v55 }
 0x393   :  { %3885 = vmatmul.mubr.msk.f32.gmra.mxu1 %vm330_vm6, %v1300_v58 }
 0x394   :  { %3921 = vmatprep.mubr.msk.f32.mxu1 %vm330_vm6, %v4560_v59 }
 0x397   :  { %3922 = vmatmul.mubr.msk.f32.vlgmr.msra.gmra.mxu1 %vm330_vm6, %v4558_v57 }
 0x398   :  { %3939 = vmatprep.mubr.msk.f32.mxu1 %vm686_vm13, %v4551_v54 }
 0x3fe   :  { %v4731_v27 = vpop.permute.xlu0 %1509 }
 0x402   :  { %v4733_v29 = vpop.permute.xlu0 %1514 }
 0x44b   :  { %v3880_v10 = vpop.f32.mrf.mxu1 }
 0x44c   :  { %v4712_v20 = vadd.f32 %v3880_v10, %v3458_v14 }
 0x44d   :  { %v1396_v11 = vpop.f32.mrf.mxu1 }
 0x44e   :  { %v4716_v21 = vadd.f32 %v3458_v14, %v1396_v11 }
 0x44f   :  { %v3883_v12 = vpop.f32.mrf.mxu1 }
 0x450   :  { %v4704_v18 = vadd.f32 %v3883_v12, %v3458_v14 }
 0x451   :  { %v1406_v13 = vpop.f32.mrf.mxu1 }
 0x452   :  { %v4708_v19 = vadd.f32 %v3458_v14, %v1406_v13 }
 0x453   :  { %v3886_v15 = vpop.f32.mrf.mxu1 }
 0x454   :  { %v4698_v16 = vadd.f32 %v3886_v15, %v3458_v14 }
 0x455   :  { %v1416_v54 = vpop.f32.mrf.mxu1 }
 0x456   :  { %v4700_v17 = vadd.f32 %v3458_v14, %v1416_v54  ;;  %3887 = vmatprep.subr.mxu0 %v4698_v16  ;;  %v2230_v14 = vld [vmem:[%s4988_s20 + $0x10] sm:$0xff] }
 0x457   :  { %3888 = vmatpush3.msra.mxu0 %v4698_v16  ;;  %v3923_v43 = vpop.f32.mrf.mxu1 }
 0x458   :  { %3889 = vmatprep.subr.mxu0 %v4700_v17 }
 0x459   :  { %3890 = vmatpush3.msra.mxu0 %v4700_v17  ;;  %v1680_v48 = vpop.f32.mrf.mxu1 }
 0x45a   :  { %3891 = vmatprep.subr.mxu0 %v4704_v18 }
 0x45b   :  { %3892 = vmatpush3.msra.mxu0 %v4704_v18 }
 0x45c   :  { %3893 = vmatprep.subr.mxu0 %v4708_v19 }
 0x45d   :  { %3894 = vmatpush3.msra.mxu0 %v4708_v19 }
 0x45e   :  { %3895 = vmatprep.subr.mxu0 %v4712_v20 }
 0x45f   :  { %3896 = vmatpush3.msra.mxu0 %v4712_v20 }
 0x460   :  { %3897 = vmatprep.subr.mxu0 %v4716_v21 }
 0x461   :  { %3898 = vmatpush3.msra.mxu0 %v4716_v21 }
 0x462   :  { %3900 = vmatmul.mubr.msk.f32.vlgmr.msra.gmra.mxu0 %vm1425_vm4, %v4721_v22  ;;  %3902 = vmatprep.subr.mxu0 %v1526_v23 }
 0x463   :  { %3903 = vmatpush3.msra.mxu0 %v1526_v23 }
 0x464   :  { %3904 = vmatprep.subr.mxu0 %v1525_v24 }
 0x465   :  { %3905 = vmatpush3.msra.mxu0 %v1525_v24 }
 0x466   :  { %3906 = vmatprep.subr.mxu0 %v1524_v25 }
 0x467   :  { %3907 = vmatpush3.msra.mxu0 %v1524_v25  ;;  %v2229_v25 = vld [vmem:[%s4988_s20 + $0x8] sm:$0xff] }
 0x468   :  { %3908 = vmatprep.subr.mxu0 %v1523_v26 }
 0x469   :  { %3909 = vmatpush3.msra.mxu0 %v1523_v26 }
 0x46a   :  { %3924 = vmatprep.subr.mxu0 %v1707_v33 }
 0x522   :  { %v3901_v28 = vpop.f32.mrf.mxu0 }
 0x523   :  { %v1518_v32 = vmul.f32 %v3901_v28, %v4733_v29 }
 0x524   :  { %v1498_v30 = vpop.f32.mrf.mxu0 }
 0x525   :  { %v1517_v31 = vmul.f32 %v4731_v27, %v1498_v30 }
 0x527   :  { %3910 = vmatprep.mubr.msk.f32.mxu0 %vm330_vm6, %v1517_v31 }
 0x528   :  { %3911 = vmatmul.mubr.msk.f32.vlgmr.msra.gmra.mxu0 %vm330_vm6, %v1518_v32  ;;  %v2228_v32 = vld [vmem:[%s4988_s20] sm:$0xff] }
 0x529   :  { %3925 = vmatpush3.msra.mxu0 %v1707_v33  ;;  %v1798_v33 = vadd.f32 %v4716_v21, %v4641_v37  ;;  %v1800_v37 = vadd.f32 %v4708_v19, %v4651_v39  ;;  %v1801_v21 = vadd.f32 %v4704_v18, %v4657_v40  ;;  %v2385_v39 = vld [vmem:[%s4989_s27 + $0x18] sm:$0xff]  ;;  %v2384_v40 = vld [vmem:[%s4989_s27 + $0x10] sm:$0xff]  ;;  %v2383_v18 = vld [vmem:[%s4989_s27 + $0x8] sm:$0xff] }
 0x52a   :  { %3926 = vmatprep.subr.mxu0 %v1706_v34 }
 0x52b   :  { %3927 = vmatpush3.msra.mxu0 %v1706_v34  ;;  %v1799_v34 = vadd.f32 %v4712_v20, %v4648_v38  ;;  %v1803_v38 = vadd.f32 %v4698_v16, %v4665_v42 }
 0x52c   :  { %3928 = vmatprep.subr.mxu0 %v1705_v35 }
 0x52d   :  { %3929 = vmatpush3.msra.mxu0 %v1705_v35  ;;  %v1802_v35 = vadd.f32 %v4700_v17, %v4659_v41  ;;  %v2382_v41 = vld [vmem:[%s4989_s27] sm:$0xff] }
 0x52e   :  { %3930 = vmatprep.subr.mxu0 %v1704_v36 }
 0x52f   :  { %3931 = vmatpush3.msra.mxu0 %v1704_v36 }
 0x5e8   :  { %v3912_v44 = vpop.f32.mrf.mxu0 }
 0x5e9   :  { %v1686_v46 = vadd.f32 %v3923_v43, %v3912_v44 }
 0x5ea   :  { %v1599_v49 = vpop.f32.mrf.mxu0 }
 0x5eb   :  { %v1697_v50 = vadd.f32 %v3471_v45, %v1686_v46  ;;  %v1681_v51 = vadd.f32 %v1680_v48, %v1599_v49  ;;  %v3505_v49 = vld [vmem:[%s4990_s4] ss:$0 sm:$0xff] }
 0x5ed   :  { %v1696_v52 = vadd.f32 %v3471_v45, %v1681_v51  ;;  %v1701_v55 = vmul.f32 0.01, %v1697_v50  ;;  %vm1699_vm5 = vcmp.gt.f32.partialorder %v1697_v50, 0.0 }
 0x5ef   :  { %v1700_v56 = vmul.f32 0.01, %v1696_v52  ;;  %vm1698_vm7 = vcmp.gt.f32.partialorder %v1696_v52, 0.0  ;;  %v1703_v58 = vsel %vm1699_vm5, %v1697_v50, %v1701_v55 }
 0x5f1   :  { %v1702_v47 = vsel %vm1698_vm7, %v1696_v52, %v1700_v56  ;;  %vm3337_vm7 = vcmask 0  }
 0x5f2   :  { %3932 = vmatprep.mubr.msk.f32.mxu0 %vm330_vm6, %v1702_v47 }
 0x5f3   :  { %3933 = vmatmul.mubr.msk.f32.vlgmr.msra.gmra.mxu0 %vm330_vm6, %v1703_v58 }
 0x5f4   :  { %3952 = vmatprep.mubr.msk.f32.mxu0 %vm686_vm13, %v4548_v53  ;;  %v2001_v53 = vld [vmem:[%s4986_s30 + $0x18] sm:$0xff] }
 0x6b3   :  { %v3934_v6 = vpop.f32.mrf.mxu0 }
 0x6b4   :  { %v1793_v9 = vadd.f32 %v3934_v6, %v3472_v1 }
 0x6b5   :  { %v1787_v10 = vpop.f32.mrf.mxu0 }
 0x6b6   :  { %v4750_v11 = vadd.f32 %v1793_v9, %v4558_v57  ;;  %v1788_v12 = vadd.f32 %v3472_v1, %v1787_v10  ;;  %v1997_v57 = vld [vmem:[%s4987_s6 + $0x18] sm:$0xff] }
 0x6b8   :  { %v4753_v13 = vadd.f32 %v1788_v12, %v4560_v59  ;;  %3935 = vmatprep.subr.mxu1 %v4750_v11  ;;  %3948 = vmatprep.subr.mxu0 %v4750_v11  ;;  %v2000_v59 = vld [vmem:[%s4986_s30 + $0x10] sm:$0xff] }
 0x6b9   :  { %3936 = vmatpush3.msra.mxu1 %v4750_v11  ;;  %3949 = vmatpush3.msra.mxu0 %v4750_v11 }
 0x6ba   :  { %3937 = vmatprep.subr.mxu1 %v4753_v13  ;;  %3950 = vmatprep.subr.mxu0 %v4753_v13 }
 0x6bb   :  { %3938 = vmatpush3.msra.mxu1 %v4753_v13  ;;  %3951 = vmatpush3.msra.mxu0 %v4753_v13 }
 0x6bc   :  { %3953 = vmatmul.mubr.msk.f32.vlgmr.msra.gmra.mxu0 %vm686_vm13, %v4567_v60  ;;  %3940 = vmatmul.mubr.msk.f32.vlgmr.msra.gmra.mxu1 %vm686_vm13, %v4570_v61  ;;  %v1996_v60 = vld [vmem:[%s4987_s6 + $0x10] sm:$0xff]  ;;  %v1999_v61 = vld [vmem:[%s4986_s30 + $0x8] sm:$0xff] }
 0x6bd   :  { %3955 = vmatprep.mubr.msk.f32.mxu0 %vm686_vm13, %v4575_v62  ;;  %3942 = vmatprep.mubr.msk.f32.mxu1 %vm686_vm13, %v4578_v63  ;;  %v1995_v62 = vld [vmem:[%s4987_s6 + $0x8] sm:$0xff]  ;;  %v1998_v63 = vld [vmem:[%s4986_s30] sm:$0xff] }
 0x6be   :  { %3961 = vmatprep.subr.mxu1 %v2001_v53  ;;  %3978 = vmatprep.subr.mxu0 %v1997_v57 }
 0x6bf   :  { %3962 = vmatpush3.msra.mxu1 %v2001_v53  ;;  %3979 = vmatpush3.msra.mxu0 %v1997_v57 }
 0x6c0   :  { %3956 = vmatmul.mubr.msk.f32.gmra.mxu0 %vm686_vm13, %v4591_v2  ;;  %3943 = vmatmul.mubr.msk.f32.gmra.mxu1 %vm686_vm13, %v4596_v3  ;;  %v1994_v2 = vld [vmem:[%s4987_s6] sm:$0xff]  ;;  %v2231_v3 = vld [vmem:[%s4988_s20 + $0x18] sm:$0xff] }
 0x6c1   :  { %3958 = vmatprep.mubr.msk.f32.mxu0 %vm686_vm13, %v4599_v4  ;;  %3945 = vmatprep.mubr.msk.f32.mxu1 %vm686_vm13, %v4602_v5 }
 0x6c2   :  { %3963 = vmatprep.subr.mxu1 %v2000_v59  ;;  %3980 = vmatprep.subr.mxu0 %v1996_v60 }
 0x6c3   :  { %3964 = vmatpush3.msra.mxu1 %v2000_v59  ;;  %3981 = vmatpush3.msra.mxu0 %v1996_v60 }
 0x6c4   :  { %3959 = vmatmul.mubr.msk.f32.gmra.mxu0 %vm686_vm13, %v4612_v7  ;;  %3946 = vmatmul.mubr.msk.f32.gmra.mxu1 %vm686_vm13, %v4617_v8 }
 0x6c5   :  { %3965 = vmatprep.subr.mxu1 %v1999_v61  ;;  %3982 = vmatprep.subr.mxu0 %v1995_v62 }
 0x6c6   :  { %3966 = vmatpush3.msra.mxu1 %v1999_v61  ;;  %3983 = vmatpush3.msra.mxu0 %v1995_v62 }
 0x6c7   :  { %3967 = vmatprep.subr.mxu1 %v1998_v63  ;;  %3984 = vmatprep.subr.mxu0 %v1994_v2 }
 0x6c8   :  { %3968 = vmatpush3.msra.mxu1 %v1998_v63  ;;  %3985 = vmatpush3.msra.mxu0 %v1994_v2 }
 0x6c9   :  { %3995 = vmatprep.subr.mxu1 %v2231_v3  ;;  %4012 = vmatprep.subr.mxu0 %v2385_v39 }
 0x77c   :  { %v3954_v4 = vpop.f32.mrf.mxu0  ;;  %v3941_v5 = vpop.f32.mrf.mxu1 }
 0x77e   :  { %v1965_v7 = vpop.f32.mrf.mxu0  ;;  %v1870_v8 = vpop.f32.mrf.mxu1 }
 0x77f   :  { %3969 = vmatprep.mubr.msk.f32.mxu1 %vm330_vm6, %v1965_v7  ;;  %3986 = vmatprep.mubr.msk.f32.mxu0 %vm330_vm6, %v1870_v8 }
 0x780   :  { %v3957_v15 = vpop.f32.mrf.mxu0  ;;  %3970 = vmatmul.mubr.msk.f32.vlgmr.msra.gmra.mxu1 %vm330_vm6, %v3954_v4  ;;  %v3944_v54 = vpop.f32.mrf.mxu1  ;;  %3987 = vmatmul.mubr.msk.f32.vlgmr.msra.gmra.mxu0 %vm330_vm6, %v3941_v5 }
 0x781   :  { %3996 = vmatpush3.msra.mxu1 %v2231_v3  ;;  %4013 = vmatpush3.msra.mxu0 %v2385_v39 }
 0x782   :  { %v1975_v23 = vpop.f32.mrf.mxu0  ;;  %v1880_v24 = vpop.f32.mrf.mxu1  ;;  %3997 = vmatprep.subr.mxu1 %v2230_v14  ;;  %4014 = vmatprep.subr.mxu0 %v2384_v40 }
 0x783   :  { %3972 = vmatprep.mubr.msk.f32.mxu1 %vm330_vm6, %v1975_v23  ;;  %3989 = vmatprep.mubr.msk.f32.mxu0 %vm330_vm6, %v1880_v24 }
 0x784   :  { %v3960_v26 = vpop.f32.mrf.mxu0  ;;  %3973 = vmatmul.mubr.msk.f32.gmra.mxu1 %vm330_vm6, %v3957_v15  ;;  %v3947_v28 = vpop.f32.mrf.mxu1  ;;  %3990 = vmatmul.mubr.msk.f32.gmra.mxu0 %vm330_vm6, %v3944_v54 }
 0x785   :  { %3998 = vmatpush3.msra.mxu1 %v2230_v14  ;;  %4015 = vmatpush3.msra.mxu0 %v2384_v40 }
 0x786   :  { %v1985_v30 = vpop.f32.mrf.mxu0  ;;  %3999 = vmatprep.subr.mxu1 %v2229_v25  ;;  %v1890_v31 = vpop.f32.mrf.mxu1  ;;  %4016 = vmatprep.subr.mxu0 %v2383_v18 }
 0x787   :  { %3975 = vmatprep.mubr.msk.f32.mxu1 %vm330_vm6, %v1985_v30  ;;  %4000 = vmatpush3.msra.mxu1 %v2229_v25 }
 0x788   :  { %3976 = vmatmul.mubr.msk.f32.gmra.mxu1 %vm330_vm6, %v3960_v26  ;;  %3992 = vmatprep.mubr.msk.f32.mxu0 %vm330_vm6, %v1890_v31 }
 0x789   :  { %4003 = vmatprep.mubr.msk.f32.mxu1 %vm330_vm6, %v1798_v33  ;;  %4001 = vmatprep.subr.mxu1 %v2228_v32  ;;  %v2590_v33 = vld [vmem:[%s4991_s28 + $0x18] sm:$0xff] }
 0x78a   :  { %3993 = vmatmul.mubr.msk.f32.gmra.mxu0 %vm330_vm6, %v3947_v28  ;;  %4002 = vmatpush3.msra.mxu1 %v2228_v32 }
 0x78b   :  { %4017 = vmatpush3.msra.mxu0 %v2383_v18 }
 0x78c   :  { %4004 = vmatmul.mubr.msk.f32.vlgmr.msra.gmra.mxu1 %vm330_vm6, %v1799_v34  ;;  %4018 = vmatprep.subr.mxu0 %v2382_v41 }
 0x78d   :  { %4006 = vmatprep.mubr.msk.f32.mxu1 %vm330_vm6, %v1800_v37  ;;  %4019 = vmatpush3.msra.mxu0 %v2382_v41 }
 0x78e   :  { %4044 = vmatprep.subr.mxu0 %v2590_v33 }
 0x790   :  { %4007 = vmatmul.mubr.msk.f32.gmra.mxu1 %vm330_vm6, %v1801_v21 }
 0x791   :  { %4009 = vmatprep.mubr.msk.f32.mxu1 %vm330_vm6, %v1802_v35 }
 0x794   :  { %4010 = vmatmul.mubr.msk.f32.gmra.mxu1 %vm330_vm6, %v1803_v38  ;;  %v3506_v38 = vld [vmem:[%s4992_s1] ss:$0 sm:$0xff] }
 0x795   :  { %4041 = vmatprep.mubr.msk.f32.mxu1 %vm1425_vm4, %v4691_v0 }
 0x840   :  { %v3971_v17 = vpop.f32.mrf.mxu1  ;;  %v3988_v42 = vpop.f32.mrf.mxu0 }
 0x841   :  { %v2205_v46 = vadd.f32 %v3988_v42, %v3971_v17 }
 0x842   :  { %v2086_v16 = vpop.f32.mrf.mxu1  ;;  %v2199_v19 = vpop.f32.mrf.mxu0 }
 0x843   :  { %v2200_v50 = vadd.f32 %v2199_v19, %v2086_v16 }
 0x844   :  { %v3974_v20 = vpop.f32.mrf.mxu1  ;;  %v3991_v0 = vpop.f32.mrf.mxu0 }
 0x845   :  { %v2215_v56 = vadd.f32 %v3991_v0, %v3974_v20  ;;  %v2586_v20 = vld [vmem:[%s4993_s2 + $0x18] sm:$0xff]  ;;  %v2584_v0 = vld [vmem:[%s4993_s2 + $0x8] sm:$0xff] }
 0x846   :  { %v2096_v36 = vpop.f32.mrf.mxu1  ;;  %v2209_v44 = vpop.f32.mrf.mxu0 }
 0x847   :  { %v2210_v6 = vadd.f32 %v2209_v44, %v2096_v36  ;;  %v2585_v36 = vld [vmem:[%s4993_s2 + $0x10] sm:$0xff]  ;;  %v2588_v44 = vld [vmem:[%s4991_s28 + $0x8] sm:$0xff] }
 0x848   :  { %v3977_v43 = vpop.f32.mrf.mxu1 }
 0x84a   :  { %v2106_v45 = vpop.f32.mrf.mxu1  ;;  %v3994_v52 = vpop.f32.mrf.mxu0 }
 0x84b   :  { %v2225_v12 = vadd.f32 %v3994_v52, %v3977_v43  ;;  %v2583_v43 = vld [vmem:[%s4993_s2] sm:$0xff]  ;;  %v2770_v52 = vld [vmem:[%s4994_s7 + $0x10] sm:$0xff] }
 0x84c   :  { %v4005_v48 = vpop.f32.mrf.mxu1  ;;  %v2219_v57 = vpop.f32.mrf.mxu0 }
 0x84d   :  { %v2346_v51 = vadd.f32 %v4005_v48, %v2205_v46  ;;  %v2220_v2 = vadd.f32 %v2219_v57, %v2106_v45  ;;  %v2587_v45 = vld [vmem:[%s4991_s28] sm:$0xff] }
 0x84e   :  { %v2316_v55 = vpop.f32.mrf.mxu1 }
 0x84f   :  { %v2359_v47 = vadd.f32 %v3505_v49, %v2346_v51  ;;  %v2345_v58 = vadd.f32 %v2316_v55, %v2200_v50  ;;  %v2771_v51 = vld [vmem:[%s4994_s7 + $0x18] sm:$0xff]  ;;  %v2769_v55 = vld [vmem:[%s4994_s7 + $0x8] sm:$0xff] }
 0x850   :  { %v4008_v1 = vpop.f32.mrf.mxu1 }
 0x851   :  { %v2358_v9 = vadd.f32 %v3505_v49, %v2345_v58  ;;  %v2348_v10 = vadd.f32 %v4008_v1, %v2215_v56  ;;  %v2371_v53 = vmul.f32 0.01, %v2359_v47  ;;  %vm2365_vm8 = vcmp.gt.f32.partialorder %v2359_v47, 0.0  ;;  %v2768_v56 = vld [vmem:[%s4994_s7] sm:$0xff] }
 0x852   :  { %v2326_v59 = vpop.f32.mrf.mxu1 }
 0x853   :  { %v2370_v60 = vmul.f32 0.01, %v2358_v9  ;;  %v2361_v61 = vadd.f32 %v3505_v49, %v2348_v10  ;;  %v2347_v62 = vadd.f32 %v2326_v59, %v2210_v6  ;;  %vm2364_vm9 = vcmp.gt.f32.partialorder %v2358_v9, 0.0 }
 0x854   :  { %v4011_v63 = vpop.f32.mrf.mxu1  ;;  %v2377_v7 = vsel %vm2365_vm8, %v2359_v47, %v2371_v53 }
 0x855   :  { %v2360_v3 = vadd.f32 %v3505_v49, %v2347_v62  ;;  %v2350_v4 = vadd.f32 %v4011_v63, %v2225_v12  ;;  %v2376_v5 = vsel %vm2364_vm9, %v2358_v9, %v2370_v60  ;;  %v2373_v8 = vmul.f32 0.01, %v2361_v61  ;;  %v2864_v62 = vld [vmem:[%s4996_s11 + $0x10] sm:$0xff]  ;;  %v2863_v63 = vld [vmem:[%s4996_s11 + $0x8] sm:$0xff] }
 0x856   :  { %v2336_v14 = vpop.f32.mrf.mxu1  ;;  %4020 = vmatprep.mubr.msk.f32.mxu0 %vm330_vm6, %v2376_v5  ;;  %vm2367_vm10 = vcmp.gt.f32.partialorder %v2361_v61, 0.0 }
 0x857   :  { %v2372_v15 = vmul.f32 0.01, %v2360_v3  ;;  %v2363_v54 = vadd.f32 %v3505_v49, %v2350_v4  ;;  %v2349_v23 = vadd.f32 %v2336_v14, %v2220_v2  ;;  %4021 = vmatmul.mubr.msk.f32.vlgmr.msra.gmra.mxu0 %vm330_vm6, %v2377_v7  ;;  %vm2366_vm11 = vcmp.gt.f32.partialorder %v2360_v3, 0.0  ;;  %v2862_v2 = vld [vmem:[%s4996_s11] sm:$0xff] }
 0x858   :  { %v2379_v28 = vsel %vm2367_vm10, %v2361_v61, %v2373_v8  ;;  %4045 = vmatpush3.msra.mxu0 %v2590_v33  ;;  %v2865_v61 = vld [vmem:[%s4996_s11 + $0x18] sm:$0xff]  ;;  %v3520_v4 = vld [vmem:[%s4997_s16] ss:$0 sm:$0xff]  ;;  %v3056_v8 = vstv %s4998_s15 }
 0x859   :  { %v2362_v24 = vadd.f32 %v3505_v49, %v2349_v23  ;;  %v2378_v25 = vsel %vm2366_vm11, %v2360_v3, %v2372_v15  ;;  %v2375_v26 = vmul.f32 0.01, %v2363_v54  ;;  %vm2369_vm13 = vcmp.gt.f32.partialorder %v2363_v54, 0.0  ;;  %v3097_v33 = vld [vmem:[%s4999_s18] sm:$0xff] }
 0x85a   :  { %4023 = vmatprep.mubr.msk.f32.mxu0 %vm330_vm6, %v2378_v25  ;;  %v4262_v3 = vmov 0.0   ;;  %v3100_v25 = vld [vmem:[%s4999_s18 + $0x18] sm:$0xff] }
 0x85b   :  { %v2374_v30 = vmul.f32 0.01, %v2362_v24  ;;  %4024 = vmatmul.mubr.msk.f32.gmra.mxu0 %vm330_vm6, %v2379_v28  ;;  %vm2368_vm12 = vcmp.gt.f32.partialorder %v2362_v24, 0.0  ;;  %v2381_v32 = vsel %vm2369_vm13, %v2363_v54, %v2375_v26  ;;  %v3099_v28 = vld [vmem:[%s4999_s18 + $0x10] sm:$0xff] }
 0x85d   :  { %v2380_v31 = vsel %vm2368_vm12, %v2362_v24, %v2374_v30 }
 0x85e   :  { %4026 = vmatprep.mubr.msk.f32.mxu0 %vm330_vm6, %v2380_v31 }
 0x85f   :  { %4027 = vmatmul.mubr.msk.f32.gmra.mxu0 %vm330_vm6, %v2381_v32 }
 0x917   :  { %v4022_v34 = vpop.f32.mrf.mxu0 }
 0x918   :  { %v2483_v16 = vadd.f32 %v4022_v34, %v3506_v38 }
 0x919   :  { %v2477_v37 = vpop.f32.mrf.mxu0 }
 0x91a   :  { %v2478_v19 = vadd.f32 %v3506_v38, %v2477_v37 }
 0x91b   :  { %v4025_v21 = vpop.f32.mrf.mxu0 }
 0x91c   :  { %v2493_v17 = vadd.f32 %v4025_v21, %v3506_v38 }
 0x91d   :  { %v2487_v35 = vpop.f32.mrf.mxu0 }
 0x91e   :  { %v2488_v42 = vadd.f32 %v3506_v38, %v2487_v35 }
 0x91f   :  { %v4028_v39 = vpop.f32.mrf.mxu0 }
 0x920   :  { %v2503_v40 = vadd.f32 %v4028_v39, %v3506_v38 }
 0x921   :  { %v2497_v18 = vpop.f32.mrf.mxu0 }
 0x922   :  { %v2498_v41 = vadd.f32 %v3506_v38, %v2497_v18  ;;  %4029 = vmatprep.subr.mxu1 %v2503_v40 }
 0x923   :  { %4030 = vmatpush3.msra.mxu1 %v2503_v40 }
 0x924   :  { %4031 = vmatprep.subr.mxu1 %v2498_v41 }
 0x925   :  { %4032 = vmatpush3.msra.mxu1 %v2498_v41 }
 0x926   :  { %4033 = vmatprep.subr.mxu1 %v2493_v17 }
 0x927   :  { %4034 = vmatpush3.msra.mxu1 %v2493_v17 }
 0x928   :  { %4035 = vmatprep.subr.mxu1 %v2488_v42 }
 0x929   :  { %4036 = vmatpush3.msra.mxu1 %v2488_v42 }
 0x92a   :  { %4037 = vmatprep.subr.mxu1 %v2483_v16 }
 0x92b   :  { %4038 = vmatpush3.msra.mxu1 %v2483_v16 }
 0x92c   :  { %4039 = vmatprep.subr.mxu1 %v2478_v19 }
 0x92d   :  { %4040 = vmatpush3.msra.mxu1 %v2478_v19 }
 0x92e   :  { %4042 = vmatmul.mubr.msk.f32.vlgmr.msra.gmra.mxu1 %vm1425_vm4, %v4721_v22  ;;  %4055 = vmatprep.subr.mxu1 %v2586_v20  ;;  %v2589_v22 = vld [vmem:[%s4991_s28 + $0x10] sm:$0xff]  ;;  %vm3052_vm4 = vcmask 15360  }
 0x92f   :  { %4056 = vmatpush3.msra.mxu1 %v2586_v20  ;;  %4063 = vmatprep.mubr.msk.f32.mxu1 %vm330_vm6, %v4753_v13 }
 0x930   :  { %4057 = vmatprep.subr.mxu1 %v2585_v36  ;;  %4046 = vmatprep.subr.mxu0 %v2589_v22 }
 0x931   :  { %4058 = vmatpush3.msra.mxu1 %v2585_v36  ;;  %4047 = vmatpush3.msra.mxu0 %v2589_v22 }
 0x932   :  { %4059 = vmatprep.subr.mxu1 %v2584_v0  ;;  %4048 = vmatprep.subr.mxu0 %v2588_v44 }
 0x933   :  { %4060 = vmatpush3.msra.mxu1 %v2584_v0  ;;  %4049 = vmatpush3.msra.mxu0 %v2588_v44 }
 0x934   :  { %4061 = vmatprep.subr.mxu1 %v2583_v43  ;;  %4050 = vmatprep.subr.mxu0 %v2587_v45 }
 0x935   :  { %4062 = vmatpush3.msra.mxu1 %v2583_v43  ;;  %4051 = vmatpush3.msra.mxu0 %v2587_v45 }
 0x936   :  { %4064 = vmatmul.mubr.msk.f32.vlgmr.msra.gmra.mxu1 %vm330_vm6, %v4750_v11  ;;  %4066 = vmatprep.subr.mxu0 %v2771_v51 }
 0x937   :  { %4077 = vmatprep.subr.mxu1 %v2865_v61 }
 0x938   :  { %4078 = vmatpush3.msra.mxu1 %v2865_v61 }
 0x939   :  { %4079 = vmatprep.subr.mxu1 %v2864_v62 }
 0x93a   :  { %4080 = vmatpush3.msra.mxu1 %v2864_v62 }
 0x93b   :  { %4081 = vmatprep.subr.mxu1 %v2863_v63 }
 0x93c   :  { %4082 = vmatpush3.msra.mxu1 %v2863_v63 }
 0x93d   :  { %4083 = vmatprep.subr.mxu1 %v2862_v2 }
 0x93e   :  { %4084 = vmatpush3.msra.mxu1 %v2862_v2 }
 0x93f   :  { %4099 = vmatprep.subr.mxu1 %v4262_v3 }
 0x9ee   :  { %v4043_v46 = vpop.f32.mrf.mxu1 }
 0x9ef   :  { %v2582_v50 = vmul.f32 %v4043_v46, %v4733_v29  ;;  %v3519_v29 = vld [vmem:[%s4995_s10] ss:$0 sm:$0xff] }
 0x9f0   :  { %v2572_v48 = vpop.f32.mrf.mxu1 }
 0x9f1   :  { %v2581_v49 = vmul.f32 %v2572_v48, %v4731_v27 }
 0x9f3   :  { %4052 = vmatprep.mubr.msk.f32.mxu0 %vm330_vm6, %v2581_v49 }
 0x9f4   :  { %4053 = vmatmul.mubr.msk.f32.vlgmr.msra.gmra.mxu0 %vm330_vm6, %v2582_v50 }
 0x9f5   :  { %4067 = vmatpush3.msra.mxu0 %v2771_v51 }
 0x9f6   :  { %4068 = vmatprep.subr.mxu0 %v2770_v52  ;;  %v4065_v27 = vpop.f32.mrf.mxu1 }
 0x9f7   :  { %4069 = vmatpush3.msra.mxu0 %v2770_v52  ;;  %v2963_v52 = vld [vmem:[%s5000_s23 + $0x18] sm:$0xff] }
 0x9f8   :  { %4070 = vmatprep.subr.mxu0 %v2769_v55  ;;  %v2744_v1 = vpop.f32.mrf.mxu1 }
 0x9f9   :  { %4071 = vmatpush3.msra.mxu0 %v2769_v55 }
 0x9fa   :  { %4072 = vmatprep.subr.mxu0 %v2768_v56 }
 0x9fb   :  { %4073 = vmatpush3.msra.mxu0 %v2768_v56 }
 0x9fc   :  { %4088 = vmatprep.subr.mxu0 %v2963_v52 }
 0xab4   :  { %v4054_v47 = vpop.f32.mrf.mxu0 }
 0xab5   :  { %v2750_v58 = vadd.f32 %v4065_v27, %v4054_v47  ;;  %v2962_v27 = vld [vmem:[%s5000_s23 + $0x10] sm:$0xff] }
 0xab6   :  { %v2663_v6 = vpop.f32.mrf.mxu0 }
 0xab7   :  { %v2761_v9 = vadd.f32 %v3519_v29, %v2750_v58  ;;  %v2745_v10 = vadd.f32 %v2744_v1, %v2663_v6  ;;  %v2960_v58 = vld [vmem:[%s5000_s23] sm:$0xff] }
 0xab9   :  { %v2760_v12 = vadd.f32 %v3519_v29, %v2745_v10  ;;  %v2765_v53 = vmul.f32 0.01, %v2761_v9  ;;  %vm2763_vm14 = vcmp.gt.f32.partialorder %v2761_v9, 0.0  ;;  %v2961_v29 = vld [vmem:[%s5000_s23 + $0x8] sm:$0xff] }
 0xabb   :  { %v2764_v57 = vmul.f32 0.01, %v2760_v12  ;;  %vm2762_vm15 = vcmp.gt.f32.partialorder %v2760_v12, 0.0  ;;  %v2767_v60 = vsel %vm2763_vm14, %v2761_v9, %v2765_v53 }
 0xabd   :  { %v2766_v59 = vsel %vm2762_vm15, %v2760_v12, %v2764_v57  ;;  %v3523_v57 = vld [vmem:[%s5001_s22] ss:$0 sm:$0xff] }
 0xabe   :  { %4074 = vmatprep.mubr.msk.f32.mxu0 %vm330_vm6, %v2766_v59 }
 0xabf   :  { %4075 = vmatmul.mubr.msk.f32.vlgmr.msra.gmra.mxu0 %vm330_vm6, %v2767_v60 }
 0xac0   :  { %4089 = vmatpush3.msra.mxu0 %v2963_v52 }
 0xac1   :  { %4090 = vmatprep.subr.mxu0 %v2962_v27 }
 0xac2   :  { %4091 = vmatpush3.msra.mxu0 %v2962_v27 }
 0xac3   :  { %4092 = vmatprep.subr.mxu0 %v2961_v29 }
 0xac4   :  { %4093 = vmatpush3.msra.mxu0 %v2961_v29 }
 0xac5   :  { %4094 = vmatprep.subr.mxu0 %v2960_v58 }
 0xac6   :  { %4095 = vmatpush3.msra.mxu0 %v2960_v58 }
 0xac7   :  { %4110 = vmatprep.subr.mxu0 %v4262_v3 }
 0xb7f   :  { %v4076_v5 = vpop.f32.mrf.mxu0 }
 0xb80   :  { %v2857_v7 = vadd.f32 %v4076_v5, %v3520_v4  ;;  %v3181_v5 = vld [vmem:[%s5002_s26 + $0x18] sm:$0xff] }
 0xb81   :  { %v2851_v14 = vpop.f32.mrf.mxu0 }
 0xb82   :  { %v2861_v15 = vadd.f32 %v2857_v7, %v4750_v11  ;;  %v2852_v54 = vadd.f32 %v3520_v4, %v2851_v14  ;;  %v3179_v14 = vld [vmem:[%s5002_s26 + $0x8] sm:$0xff] }
 0xb84   :  { %v3058_v23 = vmul.f32 %v3056_v8, %v2861_v15  ;;  %v2860_v24 = vadd.f32 %v2852_v54, %v4753_v13  ;;  %v3098_v13 = vld [vmem:[%s4999_s18 + $0x8] sm:$0xff]  ;;  %v3262_v54 = vld [vmem:[%s4498_s12 + $0x18] sm:$0xff] }
 0xb86   :  { %v3057_v26 = vmul.f32 %v3056_v8, %v2860_v24  ;;  %4085 = vmatprep.mubr.msk.f32.mxu1 %vm330_vm6, %v2860_v24  ;;  %v3060_v30 = vsel %vm330_vm6, %v3058_v23, -inf  ;;  %v3180_v8 = vld [vmem:[%s5002_s26 + $0x10] sm:$0xff] }
 0xb87   :  { %4086 = vmatmul.mubr.msk.f32.vlgmr.msra.gmra.mxu1 %vm330_vm6, %v2861_v15 }
 0xb88   :  { %v3059_v31 = vsel %vm330_vm6, %v3057_v26, -inf  ;;  %4100 = vmatpush3.msra.mxu1 %v3100_v25  ;;  %4107 = vmatprep.mubr.msk.f32.mxu1 %vm4263_vm0, %v4262_v3 }
 0xb89   :  { %v3061_v11 = vmax.f32 %v3059_v31, %v3060_v30  ;;  %4101 = vmatprep.subr.mxu1 %v4262_v3  ;;  %v3261_v31 = vld [vmem:[%s4498_s12 + $0x10] sm:$0xff] }
 0xb8a   :  { %4102 = vmatpush3.msra.mxu1 %v3099_v28 }
 0xb8b   :  { %v3062_v32 = vrot.slane %v3061_v11, 4  ;;  %4103 = vmatprep.subr.mxu1 %v4262_v3 }
 0xb8c   :  { %4104 = vmatpush3.msra.mxu1 %v3098_v13  ;;  %v3259_v13 = vld [vmem:[%s4498_s12] sm:$0xff] }
 0xb8d   :  { %v3063_v34 = vmax.f32 %v3061_v11, %v3062_v32  ;;  %4105 = vmatprep.subr.mxu1 %v4262_v3  ;;  %v3260_v11 = vld [vmem:[%s4498_s12 + $0x8] sm:$0xff]  ;;  %v3526_v32 = vld [vmem:[%s5004_s5] ss:$0 sm:$0xff]  ;;  %s4264_s12 = smov [#allocation4]  }
 0xb8e   :  { %4106 = vmatpush3.msra.mxu1 %v3097_v33  ;;  %s3347_s13 = sshll.u32 %s4264_s12, 4  ;;  %s3348_s13 = int_to_ptr.vmem [resolvable:$true] %s3347_s13 }
 0xb8f   :  { %v3064_v37 = vrot.slane %v3063_v34, 2  ;;  %4121 = vmatprep.subr.mxu1 %v4262_v3  ;;  %s4191_s17 = scalar_lea.vmem %s3348_s13, 16  ;;  %p4196_p1 = scmp.lt.s32.totalorder %s3348_s13, %s3348_s13 }
 0xb90   :  { %p4192_p0 = scmp.ne.s32.totalorder %s3348_s13, %s4191_s17 }
 0xb91   :  { %v3065_v21 = vmax.f32 %v3063_v34, %v3064_v37 }
 0xb93   :  { %v3066_v35 = vrot.slane %v3065_v21, 1 }
 0xb95   :  { %v3067_v38 = vmax.f32 %v3065_v21, %v3066_v35  ;;  %v3182_v35 = vld [vmem:[%s5005_s9] sm:$0x1] }
 0xb97   :  { %v3068_v39 = vsub.f32 %v3057_v26, %v3067_v38  ;;  %v3069_v40 = vsub.f32 %v3058_v23, %v3067_v38  ;;  %v3101_v23 = vld [vmem:[%s5003_s0] sm:$0x1] }
 0xb99   :  { %v3070_v18 = vmul.f32 1.442695, %v3068_v39  ;;  %v3072_v41 = vmul.f32 1.442695, %v3069_v40 }
 0xb9b   :  { %4185 = vpow2.f32 %v3070_v18 }
 0xb9c   :  { %4187 = vpow2.f32 %v3072_v41 }
 0xba8   :  { %v4186_v17 = vpop.eup %4185 }
 0xba9   :  { %v4188_v42 = vpop.eup %4187  ;;  %v3074_v16 = vsel %vm330_vm6, %v4186_v17, 0.0 }
 0xbaa   :  { %v3075_v19 = vsel %vm330_vm6, %v4188_v42, 0.0 }
 0xbab   :  { %v3076_v20 = vadd.f32 %v3075_v19, %v3074_v16 }
 0xbad   :  { %v3077_v36 = vrot.slane %v3076_v20, 4 }
 0xbaf   :  { %v3078_v0 = vadd.f32 %v3077_v36, %v3076_v20 }
 0xbb1   :  { %v3079_v43 = vrot.slane %v3078_v0, 2 }
 0xbb3   :  { %v3080_v22 = vadd.f32 %v3079_v43, %v3078_v0 }
 0xbb5   :  { %v3081_v44 = vrot.slane %v3080_v22, 1 }
 0xbb7   :  { %v3082_v45 = vadd.f32 %v3081_v44, %v3080_v22 }
 0xbb9   :  { %4189 = vrcp.f32 %v3082_v45 }
 0xbc6   :  { %v4190_v46 = vpop.eup %4189 }
 0xbc7   :  { %v3084_v48 = vmul.f32 %v4190_v46, %v4186_v17  ;;  %v3085_v49 = vmul.f32 %v4190_v46, %v4188_v42 }
 0xbc9   :  { %v3086_v50 = vmul.f32 %v3084_v48, %v2860_v24  ;;  %v3087_v51 = vmul.f32 %v3085_v49, %v2861_v15  ;;  %v3178_v15 = vld [vmem:[%s5002_s26] sm:$0xff] }
 0xbcb   :  { %v3088_v55 = vsel %vm330_vm6, %v3086_v50, 0.0  ;;  %v3089_v56 = vsel %vm330_vm6, %v3087_v51, 0.0 }
 0xbcc   :  { %v3090_v47 = vadd.f32 %v3089_v56, %v3088_v55 }
 0xbce   :  { %v3091_v1 = vrot.slane %v3090_v47, 4 }
 0xbd0   :  { %v3092_v6 = vadd.f32 %v3091_v1, %v3090_v47 }
 0xbd2   :  { %v3093_v9 = vrot.slane %v3092_v6, 2 }
 0xbd4   :  { %v3094_v10 = vadd.f32 %v3093_v9, %v3092_v6 }
 0xbd6   :  { %v3095_v12 = vrot.slane %v3094_v10, 1 }
 0xbd8   :  { %v3096_v53 = vadd.f32 %v3095_v12, %v3094_v10 }
 0xbda   :  { %4108 = vmatmul.mubr.msk.f32.vlgmr.msra.gmra.mxu1 %vm330_vm6, %v3096_v53 }
 0xbdb   :  { %4129 = vmatprep.mubr.msk.f32.mxu1 %vm4263_vm0, %v4262_v3  ;;  %4122 = vmatpush3.msra.mxu1 %v3262_v54 }
 0xbdc   :  { %4123 = vmatprep.subr.mxu1 %v4262_v3 }
 0xbdd   :  { %4124 = vmatpush3.msra.mxu1 %v3261_v31 }
 0xbde   :  { %4125 = vmatprep.subr.mxu1 %v4262_v3 }
 0xbdf   :  { %4126 = vmatpush3.msra.mxu1 %v3260_v11 }
 0xbe0   :  { %4127 = vmatprep.subr.mxu1 %v4262_v3 }
 0xbe1   :  { %4128 = vmatpush3.msra.mxu1 %v3259_v13 }
 0xc47   :  { %v4087_v59 = vpop.f32.mrf.mxu1 }
 0xc48   :  { %v2951_v60 = vadd.f32 %v4087_v59, %v3523_v57 }
 0xc49   :  { %v2945_v61 = vpop.f32.mrf.mxu1 }
 0xc4a   :  { %v2946_v62 = vadd.f32 %v3523_v57, %v2945_v61  ;;  %v2957_v63 = vmul.f32 0.01, %v2951_v60  ;;  %vm2955_vm1 = vcmp.gt.f32.partialorder %v2951_v60, 0.0 }
 0xc4c   :  { %vm2954_vm2 = vcmp.gt.f32.partialorder %v2946_v62, 0.0  ;;  %v2956_v2 = vmul.f32 0.01, %v2946_v62  ;;  %v2959_v7 = vsel %vm2955_vm1, %v2951_v60, %v2957_v63 }
 0xc4e   :  { %v2958_v4 = vsel %vm2954_vm2, %v2946_v62, %v2956_v2 }
 0xc4f   :  { %4096 = vmatprep.mubr.msk.f32.mxu0 %vm330_vm6, %v2958_v4 }
 0xc50   :  { %4097 = vmatmul.mubr.msk.f32.vlgmr.msra.gmra.mxu0 %vm330_vm6, %v2959_v7 }
 0xc51   :  { %4111 = vmatpush3.msra.mxu0 %v3181_v5  ;;  %4118 = vmatprep.mubr.msk.f32.mxu0 %vm4263_vm0, %v4262_v3 }
 0xc52   :  { %4112 = vmatprep.subr.mxu0 %v4262_v3 }
 0xc53   :  { %4113 = vmatpush3.msra.mxu0 %v3180_v8 }
 0xc54   :  { %4114 = vmatprep.subr.mxu0 %v4262_v3 }
 0xc55   :  { %4115 = vmatpush3.msra.mxu0 %v3179_v14 }
 0xc56   :  { %4116 = vmatprep.subr.mxu0 %v4262_v3  ;;  %v3263_v3 = vld [vmem:[#allocation3] sm:$0x1] }
 0xc57   :  { %4117 = vmatpush3.msra.mxu0 %v3178_v15 }
 0xc9a   :  { %v3171_v24 = vpop.f32.mrf.mxu1 }
 0xc9b   :  { %v3172_v25 = vadd.f32 %v3171_v24, %v3101_v23 }
 0xc9c   :  { %v4109_v26 = vpop.f32.mrf.mxu1 }
 0xc9d   :  { %vm3175_vm3 = vcmp.gt.f32.partialorder %v3172_v25, 0.0  ;;  %v3176_v28 = vmul.f32 0.01, %v3172_v25 }
 0xc9f   :  { %v3177_v30 = vsel %vm3175_vm3, %v3172_v25, %v3176_v28 }
 0xca0   :  { %4119 = vmatmul.mubr.msk.f32.vlgmr.msra.gmra.mxu0 %vm330_vm6, %v3177_v30 }
 0xd10   :  { %v4098_v33 = vpop.f32.mrf.mxu0 }
 0xd11   :  { %v3049_v34 = vadd.f32 %v4098_v33, %v3526_v32 }
 0xd12   :  { %v3043_v37 = vpop.f32.mrf.mxu0 }
 0xd13   :  { %3054 = vst.msk [vmem:[%s4506_s25 + $0x8] sm:$0xff] %vm3052_vm4, %v3049_v34  ;;  %v3044_v21 = vadd.f32 %v3526_v32, %v3043_v37 }
 0xd15   :  { %3053 = vst.msk [vmem:[%s4506_s25] sm:$0xff] %vm3052_vm4, %v3044_v21  ;;  %s4195_s25 = scalar_lea.vmem %s3348_s13, 32 }
 0xd16   :  { %p4197_p2 = scmp.lt.s32.totalorder %s4195_s25, %s4191_s17 }
 0xd18   :  { %p4198_p3 = por %p4197_p2, %p4196_p1 }
 0xd1a   :  { %p4199_p4 = pnand %p4198_p3, %p4192_p0 }
 0xd60   :  { %v3252_v38 = vpop.f32.mrf.mxu0 }
 0xd61   :  { %v3253_v39 = vadd.f32 %v3252_v38, %v3182_v35 }
 0xd62   :  { %v4120_v40 = vpop.f32.mrf.mxu0 }
 0xd63   :  { %vm3256_vm5 = vcmp.gt.f32.partialorder %v3253_v39, 0.0  ;;  %v3257_v18 = vmul.f32 0.01, %v3253_v39 }
 0xd65   :  { %v3258_v41 = vsel %vm3256_vm5, %v3253_v39, %v3257_v18 }
 0xd66   :  { %4130 = vmatmul.mubr.msk.f32.vlgmr.msra.gmra.mxu1 %vm330_vm6, %v3258_v41 }
 0xe26   :  { %v3333_v17 = vpop.f32.mrf.mxu1 }
 0xe27   :  { %v3334_v42 = vadd.f32 %v3333_v17, %v3263_v3 }
 0xe28   :  { %v4131_v16 = vpop.f32.mrf.mxu1 }
 0xe29   :  { %3338 = vst.msk [vmem:[#allocation4] sm:$0x1] %vm3337_vm7, %v3334_v42 }
 0xe2a   :  { %4202 = shalt.err (!%p4199_p4)
}
 0xe2b   :  { %3350 = dma.vmem_to_hbm [thread:$0]  %s3348_s13, 16, %s4511_s21, [#allocation5]  }
 0xe2c   :  { %4211 = dma.done.wait [#allocation5], 16  }
 0xe2d   :  { %4212 = vsyncadd [#allocation5], 4294967280 }
 0xe2e   :  { %3356 = vsyncpa [#allocation5], 1 }

</bundles_post_ra>
